<compile_context>
chip_gen: v7x
topology: tpu7x:2x2x1
jax: 0.10.0
libtpu: 0.0.40
codegen_flags: <defaults>
</compile_context>

<pallas_src>
import math

import jax
import jax.numpy as jnp
from jax.experimental import pallas as pl
from jax.experimental.pallas import tpu as pltpu

# ----------------------- small synthetic ViT-CLIP config -----------------------
BATCH = 2
IN_CH = 3
IMG = 16
PATCH = 8
GRID_HW = IMG // PATCH            # 2
N_PATCH = GRID_HW * GRID_HW       # 4
SEQ = N_PATCH + 1                 # 5 (class token + patches)
N_TOK = BATCH * SEQ               # 10 real token rows (batch flattened onto sublanes)
N_PAD = 16                        # sublane-aligned (multiple of 8) padded token rows
WIDTH = 32
HEADS = 4
HEAD_DIM = WIDTH // HEADS
MLP_DIM = 4 * WIDTH
NUM_BLOCKS = 2                    # layer = 'block1' -> keep resblocks[:2]
EPS = 1e-5
CPP = IN_CH * PATCH * PATCH
NEG_INF = -1e30                   # finite mask: exp underflows to exactly 0 (never -inf)


# ------------------------------- kernel helpers --------------------------------
def _ln_onepass(x, g, b):
    # E[x^2] - mu^2 keeps the two cross-lane reduces independent (less XLU serialization)
    mu = jnp.mean(x, axis=-1, keepdims=True)
    ms = jnp.mean(x * x, axis=-1, keepdims=True)
    return (x - mu) * jax.lax.rsqrt(ms - mu * mu + EPS) * g + b


def _split_heads(x):
    # (N_PAD, WIDTH) -> (HEADS, N_PAD, HEAD_DIM): static lane slices + leading-axis stack
    return jnp.stack([x[:, h * HEAD_DIM:(h + 1) * HEAD_DIM] for h in range(HEADS)],
                     axis=0)


# ------------------------------- fused Pallas kernel ---------------------------
def fused_vit_kernel(patches_ref, wpatch_ref, embed_ref, lnpre_g_ref, lnpre_b_ref,
                     bias_ref,
                     ln1g_ref, ln1b_ref, wqkv_ref, bqkv_ref, wo_ref, bo_ref,
                     ln2g_ref, ln2b_ref, w1_ref, b1_ref, w2_ref, b2_ref,
                     o_ref):
    f32 = jnp.float32
    bf16 = jnp.bfloat16

    # ---- patch-embed matmul (conv1 with stride == kernel) + cls/pos embed + ln_pre ----
    # Kept in f32: its output is immediately LayerNormed and lands directly in the
    # residual stream, so bf16 error here would be amplified by 1/std.
    tok = jnp.dot(patches_ref[...], wpatch_ref[...],
                  preferred_element_type=f32) + embed_ref[...]
    tok = _ln_onepass(tok, lnpre_g_ref[...], lnpre_b_ref[...])

    bias = bias_ref[...]                     # (N_PAD, N_PAD) batch/pad block-diag mask

    for blk in range(NUM_BLOCKS):            # static unroll (fine at 2 blocks; use a
        #                                      grid axis / fori_loop if this grows)
        # ---------------- multi-head self attention ----------------
        h = _ln_onepass(tok, ln1g_ref[blk], ln1b_ref[blk])               # (N, W) f32
        qkv = jnp.dot(h.astype(bf16), wqkv_ref[blk],
                      preferred_element_type=f32) + bqkv_ref[blk]        # (N, 3W)
        # 1/sqrt(head_dim) is folded into the Q columns of wqkv/bqkv at prep time.
        q = _split_heads(qkv[:, :WIDTH]).astype(bf16)                    # (H, N, D)
        k = _split_heads(qkv[:, WIDTH:2 * WIDTH]).astype(bf16)
        v = _split_heads(qkv[:, 2 * WIDTH:]).astype(bf16)

        s = jnp.einsum('hnd,hmd->hnm', q, k,
                       preferred_element_type=f32) + bias                # (H, N, N)
        # No max-subtraction: scores are O(1e-2) and the -1e30 masked entries
        # underflow exp to exactly 0 (saves one cross-lane max-reduce per block).
        p = jnp.exp(s)
        p = p * pl.reciprocal(jnp.sum(p, axis=-1, keepdims=True), approx=True)

        o3 = jnp.einsum('hnm,hmd->hnd', p.astype(bf16), v,
                        preferred_element_type=f32)                      # (H, N, D)
        o2 = jnp.concatenate([o3[hh] for hh in range(HEADS)], axis=-1)   # (N, W)
        proj = jnp.dot(o2.astype(bf16), wo_ref[blk],
                       preferred_element_type=f32)                       # (N, W)
        tok = tok + proj + bo_ref[blk]

        # ---------------- MLP with QuickGELU ----------------
        h2 = _ln_onepass(tok, ln2g_ref[blk], ln2b_ref[blk])
        m = jnp.dot(h2.astype(bf16), w1_ref[blk],
                    preferred_element_type=f32) + b1_ref[blk]
        m = m * jax.nn.sigmoid(1.702 * m)
        m = jnp.dot(m.astype(bf16), w2_ref[blk],
                    preferred_element_type=f32) + b2_ref[blk]
        tok = tok + m

    o_ref[...] = tok                          # single sublane-full (N_PAD, W) store


# --------------------------- one-time parameter prep ----------------------------
def prepare_params(params):
    """Pre-transpose / pre-arrange weights into the kernel layout (done once)."""
    scale = 1.0 / math.sqrt(HEAD_DIM)
    f32, bf16 = jnp.float32, jnp.bfloat16

    wpatch = params['conv1_w'].reshape(WIDTH, CPP).T.astype(f32)        # (CPP, W)

    # class token + positional embedding folded into one additive template (padded).
    embed_one = jnp.concatenate(
        [(params['class_embedding'] + params['pos_embedding'][0])[None, :],
         params['pos_embedding'][1:]], axis=0)                          # (SEQ, W)
    embed = jnp.tile(embed_one, (BATCH, 1))                             # (N_TOK, W)
    embed = jnp.pad(embed, ((0, N_PAD - N_TOK), (0, 0))).astype(f32)    # (N_PAD, W)

    # block-diagonal additive bias: flattened batches never attend across each other;
    # padded rows get unique ids so they only attend to themselves (values discarded).
    bids = jnp.concatenate([jnp.repeat(jnp.arange(BATCH), SEQ),
                            BATCH + jnp.arange(N_PAD - N_TOK)])
    attn_bias = jnp.where(bids[:, None] == bids[None, :], 0.0,
                          NEG_INF).astype(f32)                          # (N_PAD, N_PAD)

    kp = {
        'wpatch': wpatch, 'embed': embed, 'attn_bias': attn_bias,
        'lnpre_g': params['ln_pre_g'][None, :].astype(f32),
        'lnpre_b': params['ln_pre_b'][None, :].astype(f32),
    }
    acc = {k: [] for k in ('ln1_g', 'ln1_b', 'wqkv', 'bqkv', 'wo', 'bo',
                           'ln2_g', 'ln2_b', 'w1', 'b1', 'w2', 'b2')}
    qscale = jnp.concatenate([jnp.full((WIDTH,), scale, f32),
                              jnp.ones((2 * WIDTH,), f32)])             # (3W,)
    for blk in params['blocks']:
        acc['ln1_g'].append(blk['ln1_g'][None, :].astype(f32))
        acc['ln1_b'].append(blk['ln1_b'][None, :].astype(f32))
        # fused QKV: (W, 3W), Q third pre-scaled by 1/sqrt(head_dim); bf16 weights.
        acc['wqkv'].append((blk['in_proj_w'].T * qscale[None, :]).astype(bf16))
        acc['bqkv'].append((blk['in_proj_b'] * qscale)[None, :].astype(f32))
        acc['wo'].append(blk['out_proj_w'].T.astype(bf16))              # (W, W)
        acc['bo'].append(blk['out_proj_b'][None, :].astype(f32))
        acc['ln2_g'].append(blk['ln2_g'][None, :].astype(f32))
        acc['ln2_b'].append(blk['ln2_b'][None, :].astype(f32))
        acc['w1'].append(blk['fc1_w'].T.astype(bf16))
        acc['b1'].append(blk['fc1_b'][None, :].astype(f32))
        acc['w2'].append(blk['fc2_w'].T.astype(bf16))
        acc['b2'].append(blk['fc2_b'][None, :].astype(f32))
    for k, v in acc.items():
        kp[k] = jnp.stack(v, axis=0)          # stacked over blocks (leading axis)
    return kp


# ----------------------------------- forward -----------------------------------
def _flatten_patches(x):
    # conv1 has stride == kernel_size -> non-overlapping patch extraction (glue).
    B = x.shape[0]
    xp = x.reshape(B, IN_CH, GRID_HW, PATCH, GRID_HW, PATCH)
    xp = xp.transpose(0, 2, 4, 1, 3, 5).reshape(B, N_PATCH, CPP)
    xp = jnp.pad(xp, ((0, 0), (1, 0), (0, 0)))      # zero row = class-token slot
    xp = xp.reshape(B * SEQ, CPP)
    return jnp.pad(xp, ((0, N_PAD - N_TOK), (0, 0)))  # sublane-pad to N_PAD rows


@jax.jit
def vit_clip_layers_forward(x, kp):
    patches = _flatten_patches(x)
    args = (patches, kp['wpatch'], kp['embed'], kp['lnpre_g'], kp['lnpre_b'],
            kp['attn_bias'],
            kp['ln1_g'], kp['ln1_b'], kp['wqkv'], kp['bqkv'], kp['wo'], kp['bo'],
            kp['ln2_g'], kp['ln2_b'], kp['w1'], kp['b1'], kp['w2'], kp['b2'])
    vmem = pl.BlockSpec(memory_space=pltpu.MemorySpace.VMEM)
    out = pl.pallas_call(
        fused_vit_kernel,
        out_shape=jax.ShapeDtypeStruct((N_PAD, WIDTH), jnp.float32),
        in_specs=[vmem] * len(args),
        out_specs=vmem,
    )(*args)
    return out[:N_TOK].reshape(BATCH, SEQ, WIDTH)


# ------------------------------ reference (plain jnp) ---------------------------
def _layernorm_ref(x, g, b):
    mu = jnp.mean(x, axis=-1, keepdims=True)
    var = jnp.mean((x - mu) * (x - mu), axis=-1, keepdims=True)
    return (x - mu) * jax.lax.rsqrt(var + EPS) * g + b


def forward_ref(x, params):
    B = x.shape[0]
    xp = x.reshape(B, IN_CH, GRID_HW, PATCH, GRID_HW, PATCH)
    xp = xp.transpose(0, 2, 4, 1, 3, 5).reshape(B, N_PATCH, -1)
    tok = xp @ params['conv1_w'].reshape(WIDTH, -1).T
    cls = jnp.broadcast_to(params['class_embedding'][None, None, :], (B, 1, WIDTH))
    tok = jnp.concatenate([cls, tok], axis=1) + params['pos_embedding'][None]
    tok = _layernorm_ref(tok, params['ln_pre_g'], params['ln_pre_b'])
    for blk in params['blocks']:
        h = _layernorm_ref(tok, blk['ln1_g'], blk['ln1_b'])
        qkv = h @ blk['in_proj_w'].T + blk['in_proj_b']
        q, k, v = jnp.split(qkv, 3, axis=-1)
        q = q.reshape(B, SEQ, HEADS, HEAD_DIM)
        k = k.reshape(B, SEQ, HEADS, HEAD_DIM)
        v = v.reshape(B, SEQ, HEADS, HEAD_DIM)
        s = jnp.einsum('blhd,bmhd->bhlm', q, k) / math.sqrt(HEAD_DIM)
        p = jax.nn.softmax(s, axis=-1)
        o = jnp.einsum('bhlm,bmhd->blhd', p, v).reshape(B, SEQ, WIDTH)
        tok = tok + (o @ blk['out_proj_w'].T + blk['out_proj_b'])
        h2 = _layernorm_ref(tok, blk['ln2_g'], blk['ln2_b'])
        m = h2 @ blk['fc1_w'].T + blk['fc1_b']
        m = m * jax.nn.sigmoid(1.702 * m)
        tok = tok + (m @ blk['fc2_w'].T + blk['fc2_b'])
    return tok


# ------------------------------ deterministic params ----------------------------
def init_params(key):
    ks = jax.random.split(key, 3 + NUM_BLOCKS)

    def nrm(k, shape, scale=0.02):
        return (scale * jax.random.normal(k, shape)).astype(jnp.float32)

    params = {
        'conv1_w': nrm(ks[0], (WIDTH, IN_CH, PATCH, PATCH)),
        'class_embedding': nrm(ks[1], (WIDTH,)),
        'pos_embedding': nrm(ks[2], (SEQ, WIDTH)),
        'ln_pre_g': jnp.ones((WIDTH,), jnp.float32),
        'ln_pre_b': jnp.zeros((WIDTH,), jnp.float32),
        'blocks': [],
    }
    for i in range(NUM_BLOCKS):
        bks = jax.random.split(ks[3 + i], 8)
        params['blocks'].append({
            'ln1_g': jnp.ones((WIDTH,), jnp.float32),
            'ln1_b': jnp.zeros((WIDTH,), jnp.float32),
            'in_proj_w': nrm(bks[0], (3 * WIDTH, WIDTH)),
            'in_proj_b': nrm(bks[1], (3 * WIDTH,)),
            'out_proj_w': nrm(bks[2], (WIDTH, WIDTH)),
            'out_proj_b': nrm(bks[3], (WIDTH,)),
            'ln2_g': jnp.ones((WIDTH,), jnp.float32),
            'ln2_b': jnp.zeros((WIDTH,), jnp.float32),
            'fc1_w': nrm(bks[4], (MLP_DIM, WIDTH)),
            'fc1_b': nrm(bks[5], (MLP_DIM,)),
            'fc2_w': nrm(bks[6], (WIDTH, MLP_DIM)),
            'fc2_b': nrm(bks[7], (WIDTH,)),
        })
    return params


if __name__ == "__main__":
    key = jax.random.PRNGKey(0)
    kx, kparam = jax.random.split(key)
    x = jax.random.normal(kx, (BATCH, IN_CH, IMG, IMG), dtype=jnp.float32)
    params = init_params(kparam)
    kp = prepare_params(params)          # one-time weight re-layout (outside hot path)

    out = vit_clip_layers_forward(x, kp)
    out = jax.block_until_ready(out)

    ref = forward_ref(x, params)
    assert out.shape == (BATCH, SEQ, WIDTH), out.shape
    max_err = float(jnp.max(jnp.abs(out - ref)))
    assert max_err < 1e-3, f"mismatch vs reference: {max_err}"
    print("KERNEL_OK")
</pallas_src>

<mosaic_0001>
module attributes {stable_mosaic.version = 11 : i64} {
  func.func @fused_vit_kernel(%arg0: memref<16x192xf32, #tpu.memory_space<vmem>>, %arg1: memref<192x32xf32, #tpu.memory_space<vmem>>, %arg2: memref<16x32xf32, #tpu.memory_space<vmem>>, %arg3: memref<1x32xf32, #tpu.memory_space<vmem>>, %arg4: memref<1x32xf32, #tpu.memory_space<vmem>>, %arg5: memref<16x16xf32, #tpu.memory_space<vmem>>, %arg6: memref<2x1x32xf32, #tpu.memory_space<vmem>>, %arg7: memref<2x1x32xf32, #tpu.memory_space<vmem>>, %arg8: memref<2x32x96xbf16, #tpu.memory_space<vmem>>, %arg9: memref<2x1x96xf32, #tpu.memory_space<vmem>>, %arg10: memref<2x32x32xbf16, #tpu.memory_space<vmem>>, %arg11: memref<2x1x32xf32, #tpu.memory_space<vmem>>, %arg12: memref<2x1x32xf32, #tpu.memory_space<vmem>>, %arg13: memref<2x1x32xf32, #tpu.memory_space<vmem>>, %arg14: memref<2x32x128xbf16, #tpu.memory_space<vmem>>, %arg15: memref<2x1x128xf32, #tpu.memory_space<vmem>>, %arg16: memref<2x128x32xbf16, #tpu.memory_space<vmem>>, %arg17: memref<2x1x32xf32, #tpu.memory_space<vmem>>, %arg18: memref<16x32xf32, #tpu.memory_space<vmem>>) attributes {dimension_semantics = [], scalar_prefetch = 0 : i64, scratch_operands = 0 : i64, tpu.core_type = #tpu.core_type<tc>} {
    %c0 = arith.constant 0 : index
    %c0_0 = arith.constant 0 : index
    %0 = vector.load %arg0[%c0, %c0_0] : memref<16x192xf32, #tpu.memory_space<vmem>>, vector<16x192xf32>
    %c0_1 = arith.constant 0 : index
    %c0_2 = arith.constant 0 : index
    %1 = vector.load %arg1[%c0_1, %c0_2] : memref<192x32xf32, #tpu.memory_space<vmem>>, vector<192x32xf32>
    %cst = arith.constant dense<0.000000e+00> : vector<16x32xf32>
    %2 = tpu.matmul %0, %1, %cst {dimension_numbers = #tpu.dot_dimension_numbers<[1], [0], [0], [1], [0, 0, 1, 1], [], []>} : vector<16x192xf32>, vector<192x32xf32>, vector<16x32xf32> -> vector<16x32xf32>
    %c0_3 = arith.constant 0 : index
    %c0_4 = arith.constant 0 : index
    %3 = vector.load %arg2[%c0_3, %c0_4] : memref<16x32xf32, #tpu.memory_space<vmem>>, vector<16x32xf32>
    %4 = arith.addf %2, %3 : vector<16x32xf32>
    %c0_5 = arith.constant 0 : index
    %c0_6 = arith.constant 0 : index
    %5 = vector.load %arg3[%c0_5, %c0_6] : memref<1x32xf32, #tpu.memory_space<vmem>>, vector<1x32xf32>
    %c0_7 = arith.constant 0 : index
    %c0_8 = arith.constant 0 : index
    %6 = vector.load %arg4[%c0_7, %c0_8] : memref<1x32xf32, #tpu.memory_space<vmem>>, vector<1x32xf32>
    %cst_9 = arith.constant dense<0.000000e+00> : vector<16xf32>
    %7 = vector.multi_reduction <add>, %4, %cst_9 [1] : vector<16x32xf32> to vector<16xf32>
    %8 = vector.shape_cast %7 : vector<16xf32> to vector<16x1xf32>
    %cst_10 = arith.constant 3.200000e+01 : f32
    %9 = vector.broadcast %cst_10 : f32 to vector<16x1xf32>
    %10 = arith.divf %8, %9 : vector<16x1xf32>
    %11 = arith.mulf %4, %4 : vector<16x32xf32>
    %cst_11 = arith.constant dense<0.000000e+00> : vector<16xf32>
    %12 = vector.multi_reduction <add>, %11, %cst_11 [1] : vector<16x32xf32> to vector<16xf32>
    %13 = vector.shape_cast %12 : vector<16xf32> to vector<16x1xf32>
    %cst_12 = arith.constant 3.200000e+01 : f32
    %14 = vector.broadcast %cst_12 : f32 to vector<16x1xf32>
    %15 = arith.divf %13, %14 : vector<16x1xf32>
    %16 = vector.broadcast %10 : vector<16x1xf32> to vector<16x32xf32>
    %17 = arith.subf %4, %16 : vector<16x32xf32>
    %18 = arith.mulf %10, %10 : vector<16x1xf32>
    %19 = arith.subf %15, %18 : vector<16x1xf32>
    %cst_13 = arith.constant 9.99999974E-6 : f32
    %20 = vector.broadcast %cst_13 : f32 to vector<16x1xf32>
    %21 = arith.addf %19, %20 : vector<16x1xf32>
    %22 = math.rsqrt %21 : vector<16x1xf32>
    %23 = vector.broadcast %22 : vector<16x1xf32> to vector<16x32xf32>
    %24 = arith.mulf %17, %23 : vector<16x32xf32>
    %25 = vector.broadcast %5 : vector<1x32xf32> to vector<16x32xf32>
    %26 = arith.mulf %24, %25 : vector<16x32xf32>
    %27 = vector.broadcast %6 : vector<1x32xf32> to vector<16x32xf32>
    %28 = arith.addf %26, %27 : vector<16x32xf32>
    %c0_14 = arith.constant 0 : index
    %c0_15 = arith.constant 0 : index
    %29 = vector.load %arg5[%c0_14, %c0_15] : memref<16x16xf32, #tpu.memory_space<vmem>>, vector<16x16xf32>
    %c0_16 = arith.constant 0 : index
    %c0_17 = arith.constant 0 : index
    %c0_18 = arith.constant 0 : index
    %30 = vector.load %arg6[%c0_16, %c0_17, %c0_18] : memref<2x1x32xf32, #tpu.memory_space<vmem>>, vector<1x1x32xf32>
    %31 = vector.shape_cast %30 : vector<1x1x32xf32> to vector<1x32xf32>
    %c0_19 = arith.constant 0 : index
    %c0_20 = arith.constant 0 : index
    %c0_21 = arith.constant 0 : index
    %32 = vector.load %arg7[%c0_19, %c0_20, %c0_21] : memref<2x1x32xf32, #tpu.memory_space<vmem>>, vector<1x1x32xf32>
    %33 = vector.shape_cast %32 : vector<1x1x32xf32> to vector<1x32xf32>
    %cst_22 = arith.constant dense<0.000000e+00> : vector<16xf32>
    %34 = vector.multi_reduction <add>, %28, %cst_22 [1] : vector<16x32xf32> to vector<16xf32>
    %35 = vector.shape_cast %34 : vector<16xf32> to vector<16x1xf32>
    %cst_23 = arith.constant 3.200000e+01 : f32
    %36 = vector.broadcast %cst_23 : f32 to vector<16x1xf32>
    %37 = arith.divf %35, %36 : vector<16x1xf32>
    %38 = arith.mulf %28, %28 : vector<16x32xf32>
    %cst_24 = arith.constant dense<0.000000e+00> : vector<16xf32>
    %39 = vector.multi_reduction <add>, %38, %cst_24 [1] : vector<16x32xf32> to vector<16xf32>
    %40 = vector.shape_cast %39 : vector<16xf32> to vector<16x1xf32>
    %cst_25 = arith.constant 3.200000e+01 : f32
    %41 = vector.broadcast %cst_25 : f32 to vector<16x1xf32>
    %42 = arith.divf %40, %41 : vector<16x1xf32>
    %43 = vector.broadcast %37 : vector<16x1xf32> to vector<16x32xf32>
    %44 = arith.subf %28, %43 : vector<16x32xf32>
    %45 = arith.mulf %37, %37 : vector<16x1xf32>
    %46 = arith.subf %42, %45 : vector<16x1xf32>
    %cst_26 = arith.constant 9.99999974E-6 : f32
    %47 = vector.broadcast %cst_26 : f32 to vector<16x1xf32>
    %48 = arith.addf %46, %47 : vector<16x1xf32>
    %49 = math.rsqrt %48 : vector<16x1xf32>
    %50 = vector.broadcast %49 : vector<16x1xf32> to vector<16x32xf32>
    %51 = arith.mulf %44, %50 : vector<16x32xf32>
    %52 = vector.broadcast %31 : vector<1x32xf32> to vector<16x32xf32>
    %53 = arith.mulf %51, %52 : vector<16x32xf32>
    %54 = vector.broadcast %33 : vector<1x32xf32> to vector<16x32xf32>
    %55 = arith.addf %53, %54 : vector<16x32xf32>
    %56 = arith.truncf %55 : vector<16x32xf32> to vector<16x32xbf16>
    %c0_27 = arith.constant 0 : index
    %c0_28 = arith.constant 0 : index
    %c0_29 = arith.constant 0 : index
    %57 = vector.load %arg8[%c0_27, %c0_28, %c0_29] : memref<2x32x96xbf16, #tpu.memory_space<vmem>>, vector<1x32x96xbf16>
    %58 = vector.shape_cast %57 : vector<1x32x96xbf16> to vector<32x96xbf16>
    %cst_30 = arith.constant dense<0.000000e+00> : vector<16x96xf32>
    %59 = tpu.matmul %56, %58, %cst_30 {dimension_numbers = #tpu.dot_dimension_numbers<[1], [0], [0], [1], [0, 0, 1, 1], [], []>} : vector<16x32xbf16>, vector<32x96xbf16>, vector<16x96xf32> -> vector<16x96xf32>
    %c0_31 = arith.constant 0 : index
    %c0_32 = arith.constant 0 : index
    %c0_33 = arith.constant 0 : index
    %60 = vector.load %arg9[%c0_31, %c0_32, %c0_33] : memref<2x1x96xf32, #tpu.memory_space<vmem>>, vector<1x1x96xf32>
    %61 = vector.shape_cast %60 : vector<1x1x96xf32> to vector<1x96xf32>
    %62 = vector.broadcast %61 : vector<1x96xf32> to vector<16x96xf32>
    %63 = arith.addf %59, %62 : vector<16x96xf32>
    %64 = vector.extract_strided_slice %63 {offsets = [0, 0], sizes = [16, 32], strides = [1, 1]} : vector<16x96xf32> to vector<16x32xf32>
    %65 = vector.extract_strided_slice %64 {offsets = [0, 0], sizes = [16, 8], strides = [1, 1]} : vector<16x32xf32> to vector<16x8xf32>
    %66 = vector.extract_strided_slice %64 {offsets = [0, 8], sizes = [16, 8], strides = [1, 1]} : vector<16x32xf32> to vector<16x8xf32>
    %67 = vector.extract_strided_slice %64 {offsets = [0, 16], sizes = [16, 8], strides = [1, 1]} : vector<16x32xf32> to vector<16x8xf32>
    %68 = vector.extract_strided_slice %64 {offsets = [0, 24], sizes = [16, 8], strides = [1, 1]} : vector<16x32xf32> to vector<16x8xf32>
    %69 = vector.shape_cast %65 : vector<16x8xf32> to vector<1x16x8xf32>
    %70 = vector.shape_cast %66 : vector<16x8xf32> to vector<1x16x8xf32>
    %71 = vector.shape_cast %67 : vector<16x8xf32> to vector<1x16x8xf32>
    %72 = vector.shape_cast %68 : vector<16x8xf32> to vector<1x16x8xf32>
    %73 = tpu.concatenate %69, %70, %71, %72 in 0 : vector<1x16x8xf32>, vector<1x16x8xf32>, vector<1x16x8xf32>, vector<1x16x8xf32> -> vector<4x16x8xf32>
    %74 = arith.truncf %73 : vector<4x16x8xf32> to vector<4x16x8xbf16>
    %75 = vector.extract_strided_slice %63 {offsets = [0, 32], sizes = [16, 32], strides = [1, 1]} : vector<16x96xf32> to vector<16x32xf32>
    %76 = vector.extract_strided_slice %75 {offsets = [0, 0], sizes = [16, 8], strides = [1, 1]} : vector<16x32xf32> to vector<16x8xf32>
    %77 = vector.extract_strided_slice %75 {offsets = [0, 8], sizes = [16, 8], strides = [1, 1]} : vector<16x32xf32> to vector<16x8xf32>
    %78 = vector.extract_strided_slice %75 {offsets = [0, 16], sizes = [16, 8], strides = [1, 1]} : vector<16x32xf32> to vector<16x8xf32>
    %79 = vector.extract_strided_slice %75 {offsets = [0, 24], sizes = [16, 8], strides = [1, 1]} : vector<16x32xf32> to vector<16x8xf32>
    %80 = vector.shape_cast %76 : vector<16x8xf32> to vector<1x16x8xf32>
    %81 = vector.shape_cast %77 : vector<16x8xf32> to vector<1x16x8xf32>
    %82 = vector.shape_cast %78 : vector<16x8xf32> to vector<1x16x8xf32>
    %83 = vector.shape_cast %79 : vector<16x8xf32> to vector<1x16x8xf32>
    %84 = tpu.concatenate %80, %81, %82, %83 in 0 : vector<1x16x8xf32>, vector<1x16x8xf32>, vector<1x16x8xf32>, vector<1x16x8xf32> -> vector<4x16x8xf32>
    %85 = arith.truncf %84 : vector<4x16x8xf32> to vector<4x16x8xbf16>
    %86 = vector.extract_strided_slice %63 {offsets = [0, 64], sizes = [16, 32], strides = [1, 1]} : vector<16x96xf32> to vector<16x32xf32>
    %87 = vector.extract_strided_slice %86 {offsets = [0, 0], sizes = [16, 8], strides = [1, 1]} : vector<16x32xf32> to vector<16x8xf32>
    %88 = vector.extract_strided_slice %86 {offsets = [0, 8], sizes = [16, 8], strides = [1, 1]} : vector<16x32xf32> to vector<16x8xf32>
    %89 = vector.extract_strided_slice %86 {offsets = [0, 16], sizes = [16, 8], strides = [1, 1]} : vector<16x32xf32> to vector<16x8xf32>
    %90 = vector.extract_strided_slice %86 {offsets = [0, 24], sizes = [16, 8], strides = [1, 1]} : vector<16x32xf32> to vector<16x8xf32>
    %91 = vector.shape_cast %87 : vector<16x8xf32> to vector<1x16x8xf32>
    %92 = vector.shape_cast %88 : vector<16x8xf32> to vector<1x16x8xf32>
    %93 = vector.shape_cast %89 : vector<16x8xf32> to vector<1x16x8xf32>
    %94 = vector.shape_cast %90 : vector<16x8xf32> to vector<1x16x8xf32>
    %95 = tpu.concatenate %91, %92, %93, %94 in 0 : vector<1x16x8xf32>, vector<1x16x8xf32>, vector<1x16x8xf32>, vector<1x16x8xf32> -> vector<4x16x8xf32>
    %96 = arith.truncf %95 : vector<4x16x8xf32> to vector<4x16x8xbf16>
    "tpu.trace_start"() <{level = 10 : i32, message = "hnd,hmd->hnm"}> : () -> ()
    %cst_34 = arith.constant dense<0.000000e+00> : vector<4x16x16xf32>
    %97 = tpu.matmul %74, %85, %cst_34 {dimension_numbers = #tpu.dot_dimension_numbers<[2], [2], [1], [1], [0, 0, 0, 1, 1, 1], [0], [0]>} : vector<4x16x8xbf16>, vector<4x16x8xbf16>, vector<4x16x16xf32> -> vector<4x16x16xf32>
    "tpu.trace_stop"() : () -> ()
    %98 = vector.shape_cast %29 : vector<16x16xf32> to vector<1x16x16xf32>
    %99 = vector.broadcast %98 : vector<1x16x16xf32> to vector<4x16x16xf32>
    %100 = arith.addf %97, %99 : vector<4x16x16xf32>
    %101 = math.exp %100 : vector<4x16x16xf32>
    %cst_35 = arith.constant dense<0.000000e+00> : vector<4x16xf32>
    %102 = vector.multi_reduction <add>, %101, %cst_35 [2] : vector<4x16x16xf32> to vector<4x16xf32>
    %103 = vector.shape_cast %102 : vector<4x16xf32> to vector<4x16x1xf32>
    %104 = tpu.reciprocal %103 {approx = true} : vector<4x16x1xf32> -> vector<4x16x1xf32>
    %105 = vector.broadcast %104 : vector<4x16x1xf32> to vector<4x16x16xf32>
    %106 = arith.mulf %101, %105 : vector<4x16x16xf32>
    %107 = arith.truncf %106 : vector<4x16x16xf32> to vector<4x16x16xbf16>
    "tpu.trace_start"() <{level = 10 : i32, message = "hnm,hmd->hnd"}> : () -> ()
    %cst_36 = arith.constant dense<0.000000e+00> : vector<4x16x8xf32>
    %108 = tpu.matmul %107, %96, %cst_36 {dimension_numbers = #tpu.dot_dimension_numbers<[2], [1], [1], [2], [0, 0, 0, 1, 1, 2], [0], [0]>} : vector<4x16x16xbf16>, vector<4x16x8xbf16>, vector<4x16x8xf32> -> vector<4x16x8xf32>
    "tpu.trace_stop"() : () -> ()
    %109 = vector.extract_strided_slice %108 {offsets = [0, 0, 0], sizes = [1, 16, 8], strides = [1, 1, 1]} : vector<4x16x8xf32> to vector<1x16x8xf32>
    %110 = vector.shape_cast %109 : vector<1x16x8xf32> to vector<16x8xf32>
    %111 = vector.extract_strided_slice %108 {offsets = [1, 0, 0], sizes = [1, 16, 8], strides = [1, 1, 1]} : vector<4x16x8xf32> to vector<1x16x8xf32>
    %112 = vector.shape_cast %111 : vector<1x16x8xf32> to vector<16x8xf32>
    %113 = vector.extract_strided_slice %108 {offsets = [2, 0, 0], sizes = [1, 16, 8], strides = [1, 1, 1]} : vector<4x16x8xf32> to vector<1x16x8xf32>
    %114 = vector.shape_cast %113 : vector<1x16x8xf32> to vector<16x8xf32>
    %115 = vector.extract_strided_slice %108 {offsets = [3, 0, 0], sizes = [1, 16, 8], strides = [1, 1, 1]} : vector<4x16x8xf32> to vector<1x16x8xf32>
    %116 = vector.shape_cast %115 : vector<1x16x8xf32> to vector<16x8xf32>
    %117 = tpu.concatenate %110, %112, %114, %116 in 1 : vector<16x8xf32>, vector<16x8xf32>, vector<16x8xf32>, vector<16x8xf32> -> vector<16x32xf32>
    %118 = arith.truncf %117 : vector<16x32xf32> to vector<16x32xbf16>
    %c0_37 = arith.constant 0 : index
    %c0_38 = arith.constant 0 : index
    %c0_39 = arith.constant 0 : index
    %119 = vector.load %arg10[%c0_37, %c0_38, %c0_39] : memref<2x32x32xbf16, #tpu.memory_space<vmem>>, vector<1x32x32xbf16>
    %120 = vector.shape_cast %119 : vector<1x32x32xbf16> to vector<32x32xbf16>
    %cst_40 = arith.constant dense<0.000000e+00> : vector<16x32xf32>
    %121 = tpu.matmul %118, %120, %cst_40 {dimension_numbers = #tpu.dot_dimension_numbers<[1], [0], [0], [1], [0, 0, 1, 1], [], []>} : vector<16x32xbf16>, vector<32x32xbf16>, vector<16x32xf32> -> vector<16x32xf32>
    %122 = arith.addf %28, %121 : vector<16x32xf32>
    %c0_41 = arith.constant 0 : index
    %c0_42 = arith.constant 0 : index
    %c0_43 = arith.constant 0 : index
    %123 = vector.load %arg11[%c0_41, %c0_42, %c0_43] : memref<2x1x32xf32, #tpu.memory_space<vmem>>, vector<1x1x32xf32>
    %124 = vector.shape_cast %123 : vector<1x1x32xf32> to vector<1x32xf32>
    %125 = vector.broadcast %124 : vector<1x32xf32> to vector<16x32xf32>
    %126 = arith.addf %122, %125 : vector<16x32xf32>
    %c0_44 = arith.constant 0 : index
    %c0_45 = arith.constant 0 : index
    %c0_46 = arith.constant 0 : index
    %127 = vector.load %arg12[%c0_44, %c0_45, %c0_46] : memref<2x1x32xf32, #tpu.memory_space<vmem>>, vector<1x1x32xf32>
    %128 = vector.shape_cast %127 : vector<1x1x32xf32> to vector<1x32xf32>
    %c0_47 = arith.constant 0 : index
    %c0_48 = arith.constant 0 : index
    %c0_49 = arith.constant 0 : index
    %129 = vector.load %arg13[%c0_47, %c0_48, %c0_49] : memref<2x1x32xf32, #tpu.memory_space<vmem>>, vector<1x1x32xf32>
    %130 = vector.shape_cast %129 : vector<1x1x32xf32> to vector<1x32xf32>
    %cst_50 = arith.constant dense<0.000000e+00> : vector<16xf32>
    %131 = vector.multi_reduction <add>, %126, %cst_50 [1] : vector<16x32xf32> to vector<16xf32>
    %132 = vector.shape_cast %131 : vector<16xf32> to vector<16x1xf32>
    %cst_51 = arith.constant 3.200000e+01 : f32
    %133 = vector.broadcast %cst_51 : f32 to vector<16x1xf32>
    %134 = arith.divf %132, %133 : vector<16x1xf32>
    %135 = arith.mulf %126, %126 : vector<16x32xf32>
    %cst_52 = arith.constant dense<0.000000e+00> : vector<16xf32>
    %136 = vector.multi_reduction <add>, %135, %cst_52 [1] : vector<16x32xf32> to vector<16xf32>
    %137 = vector.shape_cast %136 : vector<16xf32> to vector<16x1xf32>
    %cst_53 = arith.constant 3.200000e+01 : f32
    %138 = vector.broadcast %cst_53 : f32 to vector<16x1xf32>
    %139 = arith.divf %137, %138 : vector<16x1xf32>
    %140 = vector.broadcast %134 : vector<16x1xf32> to vector<16x32xf32>
    %141 = arith.subf %126, %140 : vector<16x32xf32>
    %142 = arith.mulf %134, %134 : vector<16x1xf32>
    %143 = arith.subf %139, %142 : vector<16x1xf32>
    %cst_54 = arith.constant 9.99999974E-6 : f32
    %144 = vector.broadcast %cst_54 : f32 to vector<16x1xf32>
    %145 = arith.addf %143, %144 : vector<16x1xf32>
    %146 = math.rsqrt %145 : vector<16x1xf32>
    %147 = vector.broadcast %146 : vector<16x1xf32> to vector<16x32xf32>
    %148 = arith.mulf %141, %147 : vector<16x32xf32>
    %149 = vector.broadcast %128 : vector<1x32xf32> to vector<16x32xf32>
    %150 = arith.mulf %148, %149 : vector<16x32xf32>
    %151 = vector.broadcast %130 : vector<1x32xf32> to vector<16x32xf32>
    %152 = arith.addf %150, %151 : vector<16x32xf32>
    %153 = arith.truncf %152 : vector<16x32xf32> to vector<16x32xbf16>
    %c0_55 = arith.constant 0 : index
    %c0_56 = arith.constant 0 : index
    %c0_57 = arith.constant 0 : index
    %154 = vector.load %arg14[%c0_55, %c0_56, %c0_57] : memref<2x32x128xbf16, #tpu.memory_space<vmem>>, vector<1x32x128xbf16>
    %155 = vector.shape_cast %154 : vector<1x32x128xbf16> to vector<32x128xbf16>
    %cst_58 = arith.constant dense<0.000000e+00> : vector<16x128xf32>
    %156 = tpu.matmul %153, %155, %cst_58 {dimension_numbers = #tpu.dot_dimension_numbers<[1], [0], [0], [1], [0, 0, 1, 1], [], []>} : vector<16x32xbf16>, vector<32x128xbf16>, vector<16x128xf32> -> vector<16x128xf32>
    %c0_59 = arith.constant 0 : index
    %c0_60 = arith.constant 0 : index
    %c0_61 = arith.constant 0 : index
    %157 = vector.load %arg15[%c0_59, %c0_60, %c0_61] : memref<2x1x128xf32, #tpu.memory_space<vmem>>, vector<1x1x128xf32>
    %158 = vector.shape_cast %157 : vector<1x1x128xf32> to vector<1x128xf32>
    %159 = vector.broadcast %158 : vector<1x128xf32> to vector<16x128xf32>
    %160 = arith.addf %156, %159 : vector<16x128xf32>
    %cst_62 = arith.constant 1.702000e+00 : f32
    %161 = vector.broadcast %cst_62 : f32 to vector<16x128xf32>
    %162 = arith.mulf %161, %160 : vector<16x128xf32>
    %163 = arith.negf %162 : vector<16x128xf32>
    %164 = math.exp %163 : vector<16x128xf32>
    %cst_63 = arith.constant 1.000000e+00 : f32
    %165 = vector.broadcast %cst_63 : f32 to vector<16x128xf32>
    %166 = arith.addf %165, %164 : vector<16x128xf32>
    %167 = arith.divf %165, %166 : vector<16x128xf32>
    %168 = arith.mulf %160, %167 : vector<16x128xf32>
    %169 = arith.truncf %168 : vector<16x128xf32> to vector<16x128xbf16>
    %c0_64 = arith.constant 0 : index
    %c0_65 = arith.constant 0 : index
    %c0_66 = arith.constant 0 : index
    %170 = vector.load %arg16[%c0_64, %c0_65, %c0_66] : memref<2x128x32xbf16, #tpu.memory_space<vmem>>, vector<1x128x32xbf16>
    %171 = vector.shape_cast %170 : vector<1x128x32xbf16> to vector<128x32xbf16>
    %cst_67 = arith.constant dense<0.000000e+00> : vector<16x32xf32>
    %172 = tpu.matmul %169, %171, %cst_67 {dimension_numbers = #tpu.dot_dimension_numbers<[1], [0], [0], [1], [0, 0, 1, 1], [], []>} : vector<16x128xbf16>, vector<128x32xbf16>, vector<16x32xf32> -> vector<16x32xf32>
    %c0_68 = arith.constant 0 : index
    %c0_69 = arith.constant 0 : index
    %c0_70 = arith.constant 0 : index
    %173 = vector.load %arg17[%c0_68, %c0_69, %c0_70] : memref<2x1x32xf32, #tpu.memory_space<vmem>>, vector<1x1x32xf32>
    %174 = vector.shape_cast %173 : vector<1x1x32xf32> to vector<1x32xf32>
    %175 = vector.broadcast %174 : vector<1x32xf32> to vector<16x32xf32>
    %176 = arith.addf %172, %175 : vector<16x32xf32>
    %177 = arith.addf %126, %176 : vector<16x32xf32>
    %c1 = arith.constant 1 : index
    %c0_71 = arith.constant 0 : index
    %c0_72 = arith.constant 0 : index
    %178 = vector.load %arg6[%c1, %c0_71, %c0_72] : memref<2x1x32xf32, #tpu.memory_space<vmem>>, vector<1x1x32xf32>
    %179 = vector.shape_cast %178 : vector<1x1x32xf32> to vector<1x32xf32>
    %c1_73 = arith.constant 1 : index
    %c0_74 = arith.constant 0 : index
    %c0_75 = arith.constant 0 : index
    %180 = vector.load %arg7[%c1_73, %c0_74, %c0_75] : memref<2x1x32xf32, #tpu.memory_space<vmem>>, vector<1x1x32xf32>
    %181 = vector.shape_cast %180 : vector<1x1x32xf32> to vector<1x32xf32>
    %cst_76 = arith.constant dense<0.000000e+00> : vector<16xf32>
    %182 = vector.multi_reduction <add>, %177, %cst_76 [1] : vector<16x32xf32> to vector<16xf32>
    %183 = vector.shape_cast %182 : vector<16xf32> to vector<16x1xf32>
    %cst_77 = arith.constant 3.200000e+01 : f32
    %184 = vector.broadcast %cst_77 : f32 to vector<16x1xf32>
    %185 = arith.divf %183, %184 : vector<16x1xf32>
    %186 = arith.mulf %177, %177 : vector<16x32xf32>
    %cst_78 = arith.constant dense<0.000000e+00> : vector<16xf32>
    %187 = vector.multi_reduction <add>, %186, %cst_78 [1] : vector<16x32xf32> to vector<16xf32>
    %188 = vector.shape_cast %187 : vector<16xf32> to vector<16x1xf32>
    %cst_79 = arith.constant 3.200000e+01 : f32
    %189 = vector.broadcast %cst_79 : f32 to vector<16x1xf32>
    %190 = arith.divf %188, %189 : vector<16x1xf32>
    %191 = vector.broadcast %185 : vector<16x1xf32> to vector<16x32xf32>
    %192 = arith.subf %177, %191 : vector<16x32xf32>
    %193 = arith.mulf %185, %185 : vector<16x1xf32>
    %194 = arith.subf %190, %193 : vector<16x1xf32>
    %cst_80 = arith.constant 9.99999974E-6 : f32
    %195 = vector.broadcast %cst_80 : f32 to vector<16x1xf32>
    %196 = arith.addf %194, %195 : vector<16x1xf32>
    %197 = math.rsqrt %196 : vector<16x1xf32>
    %198 = vector.broadcast %197 : vector<16x1xf32> to vector<16x32xf32>
    %199 = arith.mulf %192, %198 : vector<16x32xf32>
    %200 = vector.broadcast %179 : vector<1x32xf32> to vector<16x32xf32>
    %201 = arith.mulf %199, %200 : vector<16x32xf32>
    %202 = vector.broadcast %181 : vector<1x32xf32> to vector<16x32xf32>
    %203 = arith.addf %201, %202 : vector<16x32xf32>
    %204 = arith.truncf %203 : vector<16x32xf32> to vector<16x32xbf16>
    %c1_81 = arith.constant 1 : index
    %c0_82 = arith.constant 0 : index
    %c0_83 = arith.constant 0 : index
    %205 = vector.load %arg8[%c1_81, %c0_82, %c0_83] : memref<2x32x96xbf16, #tpu.memory_space<vmem>>, vector<1x32x96xbf16>
    %206 = vector.shape_cast %205 : vector<1x32x96xbf16> to vector<32x96xbf16>
    %cst_84 = arith.constant dense<0.000000e+00> : vector<16x96xf32>
    %207 = tpu.matmul %204, %206, %cst_84 {dimension_numbers = #tpu.dot_dimension_numbers<[1], [0], [0], [1], [0, 0, 1, 1], [], []>} : vector<16x32xbf16>, vector<32x96xbf16>, vector<16x96xf32> -> vector<16x96xf32>
    %c1_85 = arith.constant 1 : index
    %c0_86 = arith.constant 0 : index
    %c0_87 = arith.constant 0 : index
    %208 = vector.load %arg9[%c1_85, %c0_86, %c0_87] : memref<2x1x96xf32, #tpu.memory_space<vmem>>, vector<1x1x96xf32>
    %209 = vector.shape_cast %208 : vector<1x1x96xf32> to vector<1x96xf32>
    %210 = vector.broadcast %209 : vector<1x96xf32> to vector<16x96xf32>
    %211 = arith.addf %207, %210 : vector<16x96xf32>
    %212 = vector.extract_strided_slice %211 {offsets = [0, 0], sizes = [16, 32], strides = [1, 1]} : vector<16x96xf32> to vector<16x32xf32>
    %213 = vector.extract_strided_slice %212 {offsets = [0, 0], sizes = [16, 8], strides = [1, 1]} : vector<16x32xf32> to vector<16x8xf32>
    %214 = vector.extract_strided_slice %212 {offsets = [0, 8], sizes = [16, 8], strides = [1, 1]} : vector<16x32xf32> to vector<16x8xf32>
    %215 = vector.extract_strided_slice %212 {offsets = [0, 16], sizes = [16, 8], strides = [1, 1]} : vector<16x32xf32> to vector<16x8xf32>
    %216 = vector.extract_strided_slice %212 {offsets = [0, 24], sizes = [16, 8], strides = [1, 1]} : vector<16x32xf32> to vector<16x8xf32>
    %217 = vector.shape_cast %213 : vector<16x8xf32> to vector<1x16x8xf32>
    %218 = vector.shape_cast %214 : vector<16x8xf32> to vector<1x16x8xf32>
    %219 = vector.shape_cast %215 : vector<16x8xf32> to vector<1x16x8xf32>
    %220 = vector.shape_cast %216 : vector<16x8xf32> to vector<1x16x8xf32>
    %221 = tpu.concatenate %217, %218, %219, %220 in 0 : vector<1x16x8xf32>, vector<1x16x8xf32>, vector<1x16x8xf32>, vector<1x16x8xf32> -> vector<4x16x8xf32>
    %222 = arith.truncf %221 : vector<4x16x8xf32> to vector<4x16x8xbf16>
    %223 = vector.extract_strided_slice %211 {offsets = [0, 32], sizes = [16, 32], strides = [1, 1]} : vector<16x96xf32> to vector<16x32xf32>
    %224 = vector.extract_strided_slice %223 {offsets = [0, 0], sizes = [16, 8], strides = [1, 1]} : vector<16x32xf32> to vector<16x8xf32>
    %225 = vector.extract_strided_slice %223 {offsets = [0, 8], sizes = [16, 8], strides = [1, 1]} : vector<16x32xf32> to vector<16x8xf32>
    %226 = vector.extract_strided_slice %223 {offsets = [0, 16], sizes = [16, 8], strides = [1, 1]} : vector<16x32xf32> to vector<16x8xf32>
    %227 = vector.extract_strided_slice %223 {offsets = [0, 24], sizes = [16, 8], strides = [1, 1]} : vector<16x32xf32> to vector<16x8xf32>
    %228 = vector.shape_cast %224 : vector<16x8xf32> to vector<1x16x8xf32>
    %229 = vector.shape_cast %225 : vector<16x8xf32> to vector<1x16x8xf32>
    %230 = vector.shape_cast %226 : vector<16x8xf32> to vector<1x16x8xf32>
    %231 = vector.shape_cast %227 : vector<16x8xf32> to vector<1x16x8xf32>
    %232 = tpu.concatenate %228, %229, %230, %231 in 0 : vector<1x16x8xf32>, vector<1x16x8xf32>, vector<1x16x8xf32>, vector<1x16x8xf32> -> vector<4x16x8xf32>
    %233 = arith.truncf %232 : vector<4x16x8xf32> to vector<4x16x8xbf16>
    %234 = vector.extract_strided_slice %211 {offsets = [0, 64], sizes = [16, 32], strides = [1, 1]} : vector<16x96xf32> to vector<16x32xf32>
    %235 = vector.extract_strided_slice %234 {offsets = [0, 0], sizes = [16, 8], strides = [1, 1]} : vector<16x32xf32> to vector<16x8xf32>
    %236 = vector.extract_strided_slice %234 {offsets = [0, 8], sizes = [16, 8], strides = [1, 1]} : vector<16x32xf32> to vector<16x8xf32>
    %237 = vector.extract_strided_slice %234 {offsets = [0, 16], sizes = [16, 8], strides = [1, 1]} : vector<16x32xf32> to vector<16x8xf32>
    %238 = vector.extract_strided_slice %234 {offsets = [0, 24], sizes = [16, 8], strides = [1, 1]} : vector<16x32xf32> to vector<16x8xf32>
    %239 = vector.shape_cast %235 : vector<16x8xf32> to vector<1x16x8xf32>
    %240 = vector.shape_cast %236 : vector<16x8xf32> to vector<1x16x8xf32>
    %241 = vector.shape_cast %237 : vector<16x8xf32> to vector<1x16x8xf32>
    %242 = vector.shape_cast %238 : vector<16x8xf32> to vector<1x16x8xf32>
    %243 = tpu.concatenate %239, %240, %241, %242 in 0 : vector<1x16x8xf32>, vector<1x16x8xf32>, vector<1x16x8xf32>, vector<1x16x8xf32> -> vector<4x16x8xf32>
    %244 = arith.truncf %243 : vector<4x16x8xf32> to vector<4x16x8xbf16>
    "tpu.trace_start"() <{level = 10 : i32, message = "hnd,hmd->hnm"}> : () -> ()
    %cst_88 = arith.constant dense<0.000000e+00> : vector<4x16x16xf32>
    %245 = tpu.matmul %222, %233, %cst_88 {dimension_numbers = #tpu.dot_dimension_numbers<[2], [2], [1], [1], [0, 0, 0, 1, 1, 1], [0], [0]>} : vector<4x16x8xbf16>, vector<4x16x8xbf16>, vector<4x16x16xf32> -> vector<4x16x16xf32>
    "tpu.trace_stop"() : () -> ()
    %246 = vector.shape_cast %29 : vector<16x16xf32> to vector<1x16x16xf32>
    %247 = vector.broadcast %246 : vector<1x16x16xf32> to vector<4x16x16xf32>
    %248 = arith.addf %245, %247 : vector<4x16x16xf32>
    %249 = math.exp %248 : vector<4x16x16xf32>
    %cst_89 = arith.constant dense<0.000000e+00> : vector<4x16xf32>
    %250 = vector.multi_reduction <add>, %249, %cst_89 [2] : vector<4x16x16xf32> to vector<4x16xf32>
    %251 = vector.shape_cast %250 : vector<4x16xf32> to vector<4x16x1xf32>
    %252 = tpu.reciprocal %251 {approx = true} : vector<4x16x1xf32> -> vector<4x16x1xf32>
    %253 = vector.broadcast %252 : vector<4x16x1xf32> to vector<4x16x16xf32>
    %254 = arith.mulf %249, %253 : vector<4x16x16xf32>
    %255 = arith.truncf %254 : vector<4x16x16xf32> to vector<4x16x16xbf16>
    "tpu.trace_start"() <{level = 10 : i32, message = "hnm,hmd->hnd"}> : () -> ()
    %cst_90 = arith.constant dense<0.000000e+00> : vector<4x16x8xf32>
    %256 = tpu.matmul %255, %244, %cst_90 {dimension_numbers = #tpu.dot_dimension_numbers<[2], [1], [1], [2], [0, 0, 0, 1, 1, 2], [0], [0]>} : vector<4x16x16xbf16>, vector<4x16x8xbf16>, vector<4x16x8xf32> -> vector<4x16x8xf32>
    "tpu.trace_stop"() : () -> ()
    %257 = vector.extract_strided_slice %256 {offsets = [0, 0, 0], sizes = [1, 16, 8], strides = [1, 1, 1]} : vector<4x16x8xf32> to vector<1x16x8xf32>
    %258 = vector.shape_cast %257 : vector<1x16x8xf32> to vector<16x8xf32>
    %259 = vector.extract_strided_slice %256 {offsets = [1, 0, 0], sizes = [1, 16, 8], strides = [1, 1, 1]} : vector<4x16x8xf32> to vector<1x16x8xf32>
    %260 = vector.shape_cast %259 : vector<1x16x8xf32> to vector<16x8xf32>
    %261 = vector.extract_strided_slice %256 {offsets = [2, 0, 0], sizes = [1, 16, 8], strides = [1, 1, 1]} : vector<4x16x8xf32> to vector<1x16x8xf32>
    %262 = vector.shape_cast %261 : vector<1x16x8xf32> to vector<16x8xf32>
    %263 = vector.extract_strided_slice %256 {offsets = [3, 0, 0], sizes = [1, 16, 8], strides = [1, 1, 1]} : vector<4x16x8xf32> to vector<1x16x8xf32>
    %264 = vector.shape_cast %263 : vector<1x16x8xf32> to vector<16x8xf32>
    %265 = tpu.concatenate %258, %260, %262, %264 in 1 : vector<16x8xf32>, vector<16x8xf32>, vector<16x8xf32>, vector<16x8xf32> -> vector<16x32xf32>
    %266 = arith.truncf %265 : vector<16x32xf32> to vector<16x32xbf16>
    %c1_91 = arith.constant 1 : index
    %c0_92 = arith.constant 0 : index
    %c0_93 = arith.constant 0 : index
    %267 = vector.load %arg10[%c1_91, %c0_92, %c0_93] : memref<2x32x32xbf16, #tpu.memory_space<vmem>>, vector<1x32x32xbf16>
    %268 = vector.shape_cast %267 : vector<1x32x32xbf16> to vector<32x32xbf16>
    %cst_94 = arith.constant dense<0.000000e+00> : vector<16x32xf32>
    %269 = tpu.matmul %266, %268, %cst_94 {dimension_numbers = #tpu.dot_dimension_numbers<[1], [0], [0], [1], [0, 0, 1, 1], [], []>} : vector<16x32xbf16>, vector<32x32xbf16>, vector<16x32xf32> -> vector<16x32xf32>
    %270 = arith.addf %177, %269 : vector<16x32xf32>
    %c1_95 = arith.constant 1 : index
    %c0_96 = arith.constant 0 : index
    %c0_97 = arith.constant 0 : index
    %271 = vector.load %arg11[%c1_95, %c0_96, %c0_97] : memref<2x1x32xf32, #tpu.memory_space<vmem>>, vector<1x1x32xf32>
    %272 = vector.shape_cast %271 : vector<1x1x32xf32> to vector<1x32xf32>
    %273 = vector.broadcast %272 : vector<1x32xf32> to vector<16x32xf32>
    %274 = arith.addf %270, %273 : vector<16x32xf32>
    %c1_98 = arith.constant 1 : index
    %c0_99 = arith.constant 0 : index
    %c0_100 = arith.constant 0 : index
    %275 = vector.load %arg12[%c1_98, %c0_99, %c0_100] : memref<2x1x32xf32, #tpu.memory_space<vmem>>, vector<1x1x32xf32>
    %276 = vector.shape_cast %275 : vector<1x1x32xf32> to vector<1x32xf32>
    %c1_101 = arith.constant 1 : index
    %c0_102 = arith.constant 0 : index
    %c0_103 = arith.constant 0 : index
    %277 = vector.load %arg13[%c1_101, %c0_102, %c0_103] : memref<2x1x32xf32, #tpu.memory_space<vmem>>, vector<1x1x32xf32>
    %278 = vector.shape_cast %277 : vector<1x1x32xf32> to vector<1x32xf32>
    %cst_104 = arith.constant dense<0.000000e+00> : vector<16xf32>
    %279 = vector.multi_reduction <add>, %274, %cst_104 [1] : vector<16x32xf32> to vector<16xf32>
    %280 = vector.shape_cast %279 : vector<16xf32> to vector<16x1xf32>
    %cst_105 = arith.constant 3.200000e+01 : f32
    %281 = vector.broadcast %cst_105 : f32 to vector<16x1xf32>
    %282 = arith.divf %280, %281 : vector<16x1xf32>
    %283 = arith.mulf %274, %274 : vector<16x32xf32>
    %cst_106 = arith.constant dense<0.000000e+00> : vector<16xf32>
    %284 = vector.multi_reduction <add>, %283, %cst_106 [1] : vector<16x32xf32> to vector<16xf32>
    %285 = vector.shape_cast %284 : vector<16xf32> to vector<16x1xf32>
    %cst_107 = arith.constant 3.200000e+01 : f32
    %286 = vector.broadcast %cst_107 : f32 to vector<16x1xf32>
    %287 = arith.divf %285, %286 : vector<16x1xf32>
    %288 = vector.broadcast %282 : vector<16x1xf32> to vector<16x32xf32>
    %289 = arith.subf %274, %288 : vector<16x32xf32>
    %290 = arith.mulf %282, %282 : vector<16x1xf32>
    %291 = arith.subf %287, %290 : vector<16x1xf32>
    %cst_108 = arith.constant 9.99999974E-6 : f32
    %292 = vector.broadcast %cst_108 : f32 to vector<16x1xf32>
    %293 = arith.addf %291, %292 : vector<16x1xf32>
    %294 = math.rsqrt %293 : vector<16x1xf32>
    %295 = vector.broadcast %294 : vector<16x1xf32> to vector<16x32xf32>
    %296 = arith.mulf %289, %295 : vector<16x32xf32>
    %297 = vector.broadcast %276 : vector<1x32xf32> to vector<16x32xf32>
    %298 = arith.mulf %296, %297 : vector<16x32xf32>
    %299 = vector.broadcast %278 : vector<1x32xf32> to vector<16x32xf32>
    %300 = arith.addf %298, %299 : vector<16x32xf32>
    %301 = arith.truncf %300 : vector<16x32xf32> to vector<16x32xbf16>
    %c1_109 = arith.constant 1 : index
    %c0_110 = arith.constant 0 : index
    %c0_111 = arith.constant 0 : index
    %302 = vector.load %arg14[%c1_109, %c0_110, %c0_111] : memref<2x32x128xbf16, #tpu.memory_space<vmem>>, vector<1x32x128xbf16>
    %303 = vector.shape_cast %302 : vector<1x32x128xbf16> to vector<32x128xbf16>
    %cst_112 = arith.constant dense<0.000000e+00> : vector<16x128xf32>
    %304 = tpu.matmul %301, %303, %cst_112 {dimension_numbers = #tpu.dot_dimension_numbers<[1], [0], [0], [1], [0, 0, 1, 1], [], []>} : vector<16x32xbf16>, vector<32x128xbf16>, vector<16x128xf32> -> vector<16x128xf32>
    %c1_113 = arith.constant 1 : index
    %c0_114 = arith.constant 0 : index
    %c0_115 = arith.constant 0 : index
    %305 = vector.load %arg15[%c1_113, %c0_114, %c0_115] : memref<2x1x128xf32, #tpu.memory_space<vmem>>, vector<1x1x128xf32>
    %306 = vector.shape_cast %305 : vector<1x1x128xf32> to vector<1x128xf32>
    %307 = vector.broadcast %306 : vector<1x128xf32> to vector<16x128xf32>
    %308 = arith.addf %304, %307 : vector<16x128xf32>
    %cst_116 = arith.constant 1.702000e+00 : f32
    %309 = vector.broadcast %cst_116 : f32 to vector<16x128xf32>
    %310 = arith.mulf %309, %308 : vector<16x128xf32>
    %311 = arith.negf %310 : vector<16x128xf32>
    %312 = math.exp %311 : vector<16x128xf32>
    %cst_117 = arith.constant 1.000000e+00 : f32
    %313 = vector.broadcast %cst_117 : f32 to vector<16x128xf32>
    %314 = arith.addf %313, %312 : vector<16x128xf32>
    %315 = arith.divf %313, %314 : vector<16x128xf32>
    %316 = arith.mulf %308, %315 : vector<16x128xf32>
    %317 = arith.truncf %316 : vector<16x128xf32> to vector<16x128xbf16>
    %c1_118 = arith.constant 1 : index
    %c0_119 = arith.constant 0 : index
    %c0_120 = arith.constant 0 : index
    %318 = vector.load %arg16[%c1_118, %c0_119, %c0_120] : memref<2x128x32xbf16, #tpu.memory_space<vmem>>, vector<1x128x32xbf16>
    %319 = vector.shape_cast %318 : vector<1x128x32xbf16> to vector<128x32xbf16>
    %cst_121 = arith.constant dense<0.000000e+00> : vector<16x32xf32>
    %320 = tpu.matmul %317, %319, %cst_121 {dimension_numbers = #tpu.dot_dimension_numbers<[1], [0], [0], [1], [0, 0, 1, 1], [], []>} : vector<16x128xbf16>, vector<128x32xbf16>, vector<16x32xf32> -> vector<16x32xf32>
    %c1_122 = arith.constant 1 : index
    %c0_123 = arith.constant 0 : index
    %c0_124 = arith.constant 0 : index
    %321 = vector.load %arg17[%c1_122, %c0_123, %c0_124] : memref<2x1x32xf32, #tpu.memory_space<vmem>>, vector<1x1x32xf32>
    %322 = vector.shape_cast %321 : vector<1x1x32xf32> to vector<1x32xf32>
    %323 = vector.broadcast %322 : vector<1x32xf32> to vector<16x32xf32>
    %324 = arith.addf %320, %323 : vector<16x32xf32>
    %325 = arith.addf %274, %324 : vector<16x32xf32>
    %c0_125 = arith.constant 0 : index
    %c0_126 = arith.constant 0 : index
    %326 = vector.load %arg18[%c0_125, %c0_126] : memref<16x32xf32, #tpu.memory_space<vmem>>, vector<16x32xf32>
    tpu.vector_store %arg18[%c0_125, %c0_126], %325 {strides = array<i32>} : memref<16x32xf32, #tpu.memory_space<vmem>>, vector<16x32xf32>,
    return
  }
}

</mosaic_0001>

<bundles_post_ra>
// kernel: vit_clip_layers_forward.1
= control target key start
LH: loop header
LB: loop body
LE: loop exit
PB: predicated region body
PF: predicated region fallthrough
CT: control target
= control target key end

     0   :  { %v2716_v0 = vmov 0.0|0.0   ;;  %vm90_vm0 = vcmask 523264   ;;  %vm174_vm1 = vcmask 261120   ;;  %vm2718_vm2 = vmmov 0   ;;  %s2720_s20 = smov 120   ;;  %s2721_s21 = smov 104   ;;  %s3390_s1 = inlined_call_operand.vmem [shape: f32[192,32], index: 1, kind: input, shape index: {}]   ;;  %s3391_s0 = inlined_call_operand.vmem [shape: f32[16,192], index: 0, kind: input, shape index: {}]   ;;  %s3392_s2 = inlined_call_operand.vmem [shape: f32[16,32], index: 2, kind: input, shape index: {}]   ;;  %s3393_s3 = inlined_call_operand.vmem [shape: f32[1,32], index: 3, kind: input, shape index: {}]   ;;  %s3394_s4 = inlined_call_operand.vmem [shape: f32[1,32], index: 4, kind: input, shape index: {}]   ;;  %s3395_s8 = inlined_call_operand.vmem [shape: bf16[2,32,96], index: 8, kind: input, shape index: {}]   ;;  %s3396_s6 = inlined_call_operand.vmem [shape: f32[2,1,32], index: 6, kind: input, shape index: {}]   ;;  %s3397_s7 = inlined_call_operand.vmem [shape: f32[2,1,32], index: 7, kind: input, shape index: {}]   ;;  %s3398_s9 = inlined_call_operand.vmem [shape: f32[2,1,96], index: 9, kind: input, shape index: {}]   ;;  %s3399_s5 = inlined_call_operand.vmem [shape: f32[16,16], index: 5, kind: input, shape index: {}]   ;;  %s3400_s10 = inlined_call_operand.vmem [shape: bf16[2,32,32], index: 10, kind: input, shape index: {}]   ;;  %s3401_s11 = inlined_call_operand.vmem [shape: f32[2,1,32], index: 11, kind: input, shape index: {}]   ;;  %s3402_s14 = inlined_call_operand.vmem [shape: bf16[2,32,128], index: 14, kind: input, shape index: {}]   ;;  %s3403_s12 = inlined_call_operand.vmem [shape: f32[2,1,32], index: 12, kind: input, shape index: {}]   ;;  %s3404_s13 = inlined_call_operand.vmem [shape: f32[2,1,32], index: 13, kind: input, shape index: {}]   ;;  %s3405_s16 = inlined_call_operand.vmem [shape: bf16[2,128,32], index: 16, kind: input, shape index: {}]   ;;  %s3406_s15 = inlined_call_operand.vmem [shape: f32[2,1,128], index: 15, kind: input, shape index: {}]   ;;  %s3407_s17 = inlined_call_operand.vmem [shape: f32[2,1,32], index: 17, kind: input, shape index: {}]   ;;  %s3408_s18 = inlined_call_operand.vmem [shape: f32[16,32], index: 18, kind: output, shape index: {}]  }
   0x1   :  { %3412 = sst [smem:[#allocation2_spill]] %s3390_s1  ;;  %2481 = vmatprep.subr.bf16.mxu0 %v2716_v0  ;;  %vm367_vm3 = vcmask 64512   ;;  %s2723_s22 = smov 64   ;;  %vm581_vm4 = vcmask 130048   ;;  %vm842_vm5 = vcmask 195584  }
   0x2   :  { %3413 = sst [smem:[#allocation3_spill]] %s3391_s0  ;;  %s3415_s29 = sld [smem:[#allocation2_spill]] }
   0x3   :  { %3414 = sst [smem:[#allocation4_spill]] %s3392_s2  ;;  %s3416_s19 = sld [smem:[#allocation3_spill]] }
   0x4   :  { %s3417_s0 = sld [smem:[#allocation4_spill]]  ;;  %s2724_s25 = smov 8  }
   0x5   :  { %s2725_s28 = smov 16   ;;  %s2726_s30 = smov 24  }
   0x8   :  { %v64_v1 = vld [vmem:[%s3415_s29] sm:$0xff]  ;;  %v65_v2 = vld [vmem:[%s3415_s29 + $0x8] sm:$0xff]  ;;  %v66_v3 = vld [vmem:[%s3415_s29 + $0x10] sm:$0xff] }
   0x9   :  { %v2482_v4 = vpack.c.bf16 %v65_v2, %v64_v1  ;;  %v67_v5 = vld [vmem:[%s3415_s29 + $0x18] sm:$0xff]  ;;  %v68_v7 = vld [vmem:[%s3415_s29 + $0x20] sm:$0xff]  ;;  %v69_v8 = vld [vmem:[%s3415_s29 + $0x28] sm:$0xff] }
   0xa   :  { %v2485_v6 = vpack.c.bf16 %v67_v5, %v66_v3  ;;  %v2488_v9 = vpack.c.bf16 %v69_v8, %v68_v7  ;;  %v70_v10 = vld [vmem:[%s3415_s29 + $0x30] sm:$0xff]  ;;  %v71_v11 = vld [vmem:[%s3415_s29 + $0x38] sm:$0xff]  ;;  %v61_v12 = vld [vmem:[%s3416_s19 + $0x8] sm:$0xff] }
   0xb   :  { %2483 = vmatpush1.bf16.msra.mxu0 %v2482_v4  ;;  %2119 = vmatprep.mubr.msk.f32.mxu0 %vm90_vm0, %v61_v12  ;;  %v2491_v13 = vpack.c.bf16 %v71_v11, %v70_v10  ;;  %v72_v14 = vld [vmem:[%s3415_s29 + $0x40] sm:$0xff]  ;;  %v73_v15 = vld [vmem:[%s3415_s29 + $0x48] sm:$0xff]  ;;  %v74_v17 = vld [vmem:[%s3415_s29 + $0x50] sm:$0xff] }
   0xc   :  { %2484 = vmatprep.subr.bf16.mxu0 %v2716_v0  ;;  %v2494_v16 = vpack.c.bf16 %v73_v15, %v72_v14  ;;  %v75_v18 = vld [vmem:[%s3415_s29 + $0x58] sm:$0xff]  ;;  %v76_v20 = vld [vmem:[%s3415_s29 + $0x60] sm:$0xff]  ;;  %v77_v21 = vld [vmem:[%s3415_s29 + $0x68] sm:$0xff] }
   0xd   :  { %v2497_v19 = vpack.c.bf16 %v75_v18, %v74_v17  ;;  %v2500_v22 = vpack.c.bf16 %v77_v21, %v76_v20  ;;  %v78_v23 = vld [vmem:[%s3415_s29 + $0x70] sm:$0xff]  ;;  %v79_v24 = vld [vmem:[%s3415_s29 + $0x78] sm:$0xff]  ;;  %v80_v26 = vld [vmem:[%s3415_s29 + $0x80] sm:$0xff] }
   0xe   :  { %v2503_v25 = vpack.c.bf16 %v79_v24, %v78_v23  ;;  %v81_v27 = vld [vmem:[%s3415_s29 + $0x88] sm:$0xff]  ;;  %v82_v29 = vld [vmem:[%s3415_s29 + $0x90] sm:$0xff]  ;;  %v83_v30 = vld [vmem:[%s3415_s29 + $0x98] sm:$0xff]  ;;  %v2717_v23 = vmov 0.0  }
   0xf   :  { %2486 = vmatpush1.bf16.msra.mxu0 %v2485_v6  ;;  %v2506_v28 = vpack.c.bf16 %v81_v27, %v80_v26  ;;  %v2509_v31 = vpack.c.bf16 %v83_v30, %v82_v29  ;;  %v84_v32 = vld [vmem:[%s3415_s29 + $0xa0] sm:$0xff]  ;;  %v85_v33 = vld [vmem:[%s3415_s29 + $0xa8] sm:$0xff]  ;;  %v86_v35 = vld [vmem:[%s3415_s29 + $0xb0] sm:$0xff]  ;;  %2297 = vmatprep.subr.bf16.mxu1 %v2717_v23 }
  0x10   :  { %2487 = vmatprep.subr.bf16.mxu0 %v2716_v0  ;;  %v2512_v34 = vpack.c.bf16 %v85_v33, %v84_v32  ;;  %v87_v36 = vld [vmem:[%s3415_s29 + $0xb8] sm:$0xff]  ;;  %v60_v38 = vld [vmem:[%s3416_s19] sm:$0xff]  ;;  %v62_v40 = vld [vmem:[%s3416_s19 + $0x10] sm:$0xff]  ;;  %2301 = vmatprep.mubr.msk.bf16.mxu1 %vm2718_vm2, %v2717_v23 }
  0x11   :  { %v2515_v37 = vpack.c.bf16 %v87_v36, %v86_v35  ;;  %v63_v39 = vld [vmem:[%s3416_s19 + $0x18] sm:$0xff]  ;;  %v88_v41 = vld [vmem:[%s3417_s0] sm:$0xff]  ;;  %v89_v45 = vld [vmem:[%s3417_s0 + $0x8] sm:$0xff]  ;;  %s2719_s0 = smov 112   ;;  %s2722_s19 = smov 96  }
  0x12   :  { %v2121_v7 = vld [vmem:[%s3393_s3] ss:$0 sm:$0xff] }
  0x13   :  { %2489 = vmatpush1.bf16.msra.mxu0 %v2488_v9  ;;  %v2122_v9 = vld [vmem:[%s3394_s4] ss:$0 sm:$0xff] }
  0x14   :  { %2490 = vmatprep.subr.bf16.mxu0 %v2716_v0  ;;  %v2588_v24 = vld [vmem:[%s3395_s8] sm:$0xff]  }
  0x15   :  { %2298 = vmatpush3.bf16.msra.mxu1 %v2588_v24  ;;  %v3027_v24 = vld [vmem:[%s3399_s5 + $0x8] sm:$0xff] }
  0x16   :  { %2299 = vmatprep.subr.bf16.mxu1 %v2717_v23 }
  0x17   :  { %2492 = vmatpush1.bf16.msra.mxu0 %v2491_v13 }
  0x18   :  { %2493 = vmatprep.subr.bf16.mxu0 %v2716_v0 }
  0x1b   :  { %2495 = vmatpush1.bf16.msra.mxu0 %v2494_v16 }
  0x1c   :  { %2496 = vmatprep.subr.bf16.mxu0 %v2716_v0 }
  0x1f   :  { %2498 = vmatpush1.bf16.msra.mxu0 %v2497_v19 }
  0x20   :  { %2499 = vmatprep.subr.bf16.mxu0 %v2716_v0 }
  0x23   :  { %2501 = vmatpush1.bf16.msra.mxu0 %v2500_v22 }
  0x24   :  { %2502 = vmatprep.subr.bf16.mxu0 %v2716_v0 }
  0x27   :  { %2504 = vmatpush1.bf16.msra.mxu0 %v2503_v25  ;;  %v2589_v25 = vld [vmem:[%s3395_s8 + $0x8] sm:$0xff]  }
  0x28   :  { %2505 = vmatprep.subr.bf16.mxu0 %v2716_v0  ;;  %2300 = vmatpush3.bf16.msra.mxu1 %v2589_v25 }
  0x29   :  { %2305 = vmatprep.subr.bf16.mxu1 %v2717_v23 }
  0x2b   :  { %2507 = vmatpush1.bf16.msra.mxu0 %v2506_v28 }
  0x2c   :  { %2508 = vmatprep.subr.bf16.mxu0 %v2716_v0 }
  0x2f   :  { %2510 = vmatpush1.bf16.msra.mxu0 %v2509_v31 }
  0x30   :  { %2511 = vmatprep.subr.bf16.mxu0 %v2716_v0 }
  0x33   :  { %2513 = vmatpush1.bf16.msra.mxu0 %v2512_v34 }
  0x34   :  { %2514 = vmatprep.subr.bf16.mxu0 %v2716_v0 }
  0x37   :  { %2516 = vmatpush1.bf16.msra.mxu0 %v2515_v37 }
  0x38   :  { %2361 = vmatprep.subr.bf16.mxu0 %v2717_v23 }
  0x3a   :  { %162 = vmatmul.mubr.f32.vlgmr.msra.gmra.mrb[0].mxu0 %v60_v38 }
  0x3b   :  { %2120 = vmatprep.mubr.msk.f32.mxu0 %vm90_vm0, %v63_v39 }
  0x3e   :  { %167 = vmatmul.mubr.f32.gmra.mrb[2].mxu0 %v62_v40 }
  0x3f   :  { %2365 = vmatprep.mubr.msk.bf16.mxu0 %vm2718_vm2, %v2717_v23 }
 0x10d   :  { %v163_v42 = vpop.f32.mrb[0].mxu0 }
 0x10e   :  { %v164_v43 = vadd.f32 %v163_v42, %v88_v41  ;;  %v165_v44 = vpop.f32.mrb[1].mxu0 }
 0x110   :  { %v175_v46 = vsel %vm174_vm1, %v164_v43, 0.0  ;;  %v184_v47 = vmul.f32 %v164_v43, %v164_v43 }
 0x111   :  { %v168_v48 = vpop.f32.mrb[2].mxu0  ;;  %176 = vadd.xlane.f32.xlu0 %v175_v46 }
 0x112   :  { %v169_v49 = vadd.f32 %v168_v48, %v89_v45  ;;  %v170_v50 = vpop.f32.mrb[3].mxu0  ;;  %v186_v51 = vsel %vm174_vm1, %v184_v47, 0.0  ;;  %v2124_v48 = vld [vmem:[%s3397_s7] ss:$0 sm:$0xff] }
 0x113   :  { %187 = vadd.xlane.f32.xlu1 %v186_v51 }
 0x114   :  { %v178_v52 = vsel %vm174_vm1, %v169_v49, 0.0  ;;  %v185_v53 = vmul.f32 %v169_v49, %v169_v49 }
 0x115   :  { %179 = vadd.xlane.f32.xlu0 %v178_v52 }
 0x116   :  { %v189_v54 = vsel %vm174_vm1, %v185_v53, 0.0  ;;  %v2125_v53 = vld [vmem:[%s3398_s9] ss:$0 sm:$0xff] }
 0x117   :  { %190 = vadd.xlane.f32.xlu1 %v189_v54 }
 0x19e   :  { %v177_v55 = vpop.xlane.xlu0 %176 }
 0x19f   :  { %v182_v56 = vmul.f32 0.03125, %v177_v55 }
 0x1a0   :  { %v188_v57 = vpop.xlane.xlu1 %187 }
 0x1a1   :  { %v196_v58 = vmul.f32 %v182_v56, %v182_v56  ;;  %v192_v59 = vmul.f32 0.03125, %v188_v57  ;;  %v194_v5 = vsub.f32 %v164_v43, %v182_v56  ;;  %v2123_v43 = vld [vmem:[%s3396_s6] ss:$0 sm:$0xff] }
 0x1a2   :  { %v180_v60 = vpop.xlane.xlu0 %179 }
 0x1a3   :  { %v198_v61 = vsub.f32 %v192_v59, %v196_v58  ;;  %v183_v62 = vmul.f32 0.03125, %v180_v60 }
 0x1a4   :  { %v191_v63 = vpop.xlane.xlu1 %190 }
 0x1a5   :  { %v200_v0 = vadd.f32 1e-05, %v198_v61  ;;  %v197_v1 = vmul.f32 %v183_v62, %v183_v62  ;;  %v193_v2 = vmul.f32 0.03125, %v191_v63  ;;  %v195_v10 = vsub.f32 %v169_v49, %v183_v62 }
 0x1a7   :  { %2616 = vrsqrt.f32 %v200_v0  ;;  %v199_v3 = vsub.f32 %v193_v2, %v197_v1 }
 0x1a9   :  { %v201_v4 = vadd.f32 1e-05, %v199_v3 }
 0x1ab   :  { %2618 = vrsqrt.f32 %v201_v4 }
 0x1b1   :  { %v2617_v6 = vpop.eup %2616 }
 0x1b2   :  { %v204_v8 = vmul.f32 %v2617_v6, %v194_v5 }
 0x1b4   :  { %v212_v11 = vmul.f32 %v2121_v7, %v204_v8 }
 0x1b5   :  { %v2619_v12 = vpop.eup %2618 }
 0x1b6   :  { %v2936_v13 = vadd.f32 %v2122_v9, %v212_v11  ;;  %v205_v14 = vmul.f32 %v2619_v12, %v195_v10 }
 0x1b8   :  { %v226_v15 = vsel %vm174_vm1, %v2936_v13, 0.0  ;;  %v234_v16 = vmul.f32 %v2936_v13, %v2936_v13  ;;  %v213_v17 = vmul.f32 %v2121_v7, %v205_v14 }
 0x1b9   :  { %227 = vadd.xlane.f32.xlu0 %v226_v15 }
 0x1ba   :  { %v2942_v18 = vadd.f32 %v2122_v9, %v213_v17  ;;  %v236_v19 = vsel %vm174_vm1, %v234_v16, 0.0 }
 0x1bc   :  { %v229_v20 = vsel %vm174_vm1, %v2942_v18, 0.0  ;;  %v235_v21 = vmul.f32 %v2942_v18, %v2942_v18 }
 0x1bd   :  { %237 = vadd.xlane.f32.xlu0 %v236_v19  ;;  %230 = vadd.xlane.f32.xlu1 %v229_v20 }
 0x1be   :  { %v239_v22 = vsel %vm174_vm1, %v235_v21, 0.0  ;;  %v3022_v21 = vld [vmem:[%s3399_s5] sm:$0xff] }
 0x1c1   :  { %240 = vadd.xlane.f32.xlu1 %v239_v22 }
 0x246   :  { %v228_v26 = vpop.xlane.xlu0 %227 }
 0x247   :  { %v232_v27 = vmul.f32 0.03125, %v228_v26 }
 0x249   :  { %v246_v30 = vmul.f32 %v232_v27, %v232_v27  ;;  %v244_v40 = vsub.f32 %v2936_v13, %v232_v27 }
 0x24a   :  { %v231_v28 = vpop.xlane.xlu1 %230  ;;  %v238_v29 = vpop.xlane.xlu0 %237 }
 0x24b   :  { %v233_v31 = vmul.f32 0.03125, %v231_v28  ;;  %v242_v32 = vmul.f32 0.03125, %v238_v29 }
 0x24d   :  { %v248_v33 = vsub.f32 %v242_v32, %v246_v30  ;;  %v247_v35 = vmul.f32 %v233_v31, %v233_v31  ;;  %v245_v44 = vsub.f32 %v2942_v18, %v233_v31 }
 0x24e   :  { %v241_v34 = vpop.xlane.xlu1 %240 }
 0x24f   :  { %v250_v36 = vadd.f32 1e-05, %v248_v33  ;;  %v243_v37 = vmul.f32 0.03125, %v241_v34 }
 0x251   :  { %2620 = vrsqrt.f32 %v250_v36  ;;  %v249_v38 = vsub.f32 %v243_v37, %v247_v35 }
 0x253   :  { %v251_v39 = vadd.f32 1e-05, %v249_v38 }
 0x255   :  { %2622 = vrsqrt.f32 %v251_v39 }
 0x25b   :  { %v2621_v41 = vpop.eup %2620 }
 0x25c   :  { %v254_v42 = vmul.f32 %v2621_v41, %v244_v40 }
 0x25e   :  { %v262_v47 = vmul.f32 %v2123_v43, %v254_v42 }
 0x25f   :  { %v2623_v45 = vpop.eup %2622 }
 0x260   :  { %v255_v46 = vmul.f32 %v2623_v45, %v245_v44  ;;  %v270_v50 = vadd.f32 %v2124_v48, %v262_v47 }
 0x262   :  { %v263_v49 = vmul.f32 %v2123_v43, %v255_v46 }
 0x264   :  { %v271_v51 = vadd.f32 %v2124_v48, %v263_v49 }
 0x266   :  { %v272_v52 = vpack.c.bf16 %v271_v51, %v270_v50 }
 0x268   :  { %2302 = vmatmul.mubr.msk.bf16.vlgmr.msra.gmra.mrb[0].mxu1 %vm174_vm1, %v272_v52 }
 0x269   :  { %2307 = vmatprep.mubr.msk.bf16.mxu1 %vm2718_vm2, %v2717_v23 }
 0x33b   :  { %v333_v54 = vpop.f32.mrb[0].mxu1 }
 0x33c   :  { %v2303_v55 = vpop.f32.mrb[1].mxu1  ;;  %v334_v57 = vadd.f32 %v2125_v53, %v333_v54 }
 0x33d   :  { %v336_v56 = vpop.f32.mrb[2].mxu1 }
 0x33e   :  { %v337_v58 = vadd.f32 %v2125_v53, %v336_v56  ;;  %v2304_v59 = vpop.f32.mrb[3].mxu1 }
 0x340   :  { %v2533_v60 = vpack.i.bf16 %v337_v58, %v334_v57  ;;  %v360_v61 = vpack.c.bf16 %v337_v58, %v334_v57 }
 0x342   :  { %2534 = vrot.lane.b32.xlu1 %v2533_v60, %s2719_s0  ;;  %2529 = vrot.lane.b32.xlu0 %v2533_v60, %s2720_s20 }
 0x346   :  { %2539 = vrot.lane.b32.xlu1 %v2533_v60, %s2721_s21 }
 0x34a   :  { %365 = vrot.lane.b32.xlu1 %v360_v61, %s2722_s19 }
 0x3b4   :  { %v2535_v62 = vpop.permute.xlu1 %2534  ;;  %v2530_v63 = vpop.permute.xlu0 %2529 }
 0x3b5   :  { %v2537_v0 = vunpack.i.h.bf16 %v2535_v62  ;;  %v2536_v1 = vunpack.i.l.bf16 %v2535_v62  ;;  %v2532_v2 = vunpack.i.h.bf16 %v2530_v63  ;;  %v2531_v3 = vunpack.i.l.bf16 %v2530_v63 }
 0x3b7   :  { %v2982_v4 = vpack.c.bf16 %v2537_v0, %v2536_v1  ;;  %v2984_v5 = vpack.c.bf16 %v2532_v2, %v2531_v3 }
 0x3b8   :  { %v2540_v6 = vpop.permute.xlu1 %2539 }
 0x3b9   :  { %v2542_v7 = vunpack.i.h.bf16 %v2540_v6  ;;  %v2541_v8 = vunpack.i.l.bf16 %v2540_v6  ;;  %416 = vrot.lane.b32.xlu0 %v2984_v5, %s2722_s19  ;;  %466 = vrot.lane.b32.xlu1 %v2982_v4, %s2722_s19 }
 0x3bb   :  { %v2990_v9 = vpack.c.bf16 %v2542_v7, %v2541_v8 }
 0x3bc   :  { %v366_v10 = vpop.permute.xlu1 %365 }
 0x3bd   :  { %v372_v11 = vsel %vm367_vm3, %v366_v10, 0  ;;  %516 = vrot.lane.b32.xlu0 %v2990_v9, %s2722_s19  ;;  %626 = vrot.lane.b32.xlu1 %v360_v61, %s2723_s22 }
 0x3be   :  { %2306 = vmatpush3.bf16.xpose.msra.mxu1 %v372_v11 }
 0x3bf   :  { %2311 = vmatprep.subr.bf16.mxu1 %v2717_v23 }
 0x3c5   :  { %2308 = vmatmul.mubr.msk.bf16.vlgmr.msra.gmra.mrb[4].mxu1 %vm367_vm3, %v360_v61 }
 0x3c6   :  { %2313 = vmatprep.mubr.msk.bf16.mxu1 %vm2718_vm2, %v2717_v23 }
 0x42b   :  { %v417_v12 = vpop.permute.xlu0 %416  ;;  %v467_v15 = vpop.permute.xlu1 %466 }
 0x42c   :  { %v422_v14 = vsel %vm367_vm3, %v417_v12, 0  ;;  %v472_v16 = vsel %vm367_vm3, %v467_v15, 0 }
 0x42d   :  { %2312 = vmatpush3.bf16.xpose.msra.mxu1 %v422_v14 }
 0x42e   :  { %2317 = vmatprep.subr.bf16.mxu1 %v2717_v23 }
 0x42f   :  { %v517_v17 = vpop.permute.xlu0 %516  ;;  %v627_v20 = vpop.permute.xlu1 %626 }
 0x430   :  { %v522_v19 = vsel %vm367_vm3, %v517_v17, 0 }
 0x434   :  { %2314 = vmatmul.mubr.msk.bf16.vlgmr.msra.gmra.mrb[8].mxu1 %vm367_vm3, %v2984_v5 }
 0x435   :  { %2318 = vmatpush3.bf16.xpose.msra.mxu1 %v472_v16  ;;  %2319 = vmatprep.mubr.msk.bf16.mxu1 %vm2718_vm2, %v2717_v23 }
 0x436   :  { %2323 = vmatprep.subr.bf16.mxu1 %v2717_v23 }
 0x43c   :  { %2320 = vmatmul.mubr.msk.bf16.vlgmr.msra.gmra.mrb[12].mxu1 %vm367_vm3, %v2982_v4 }
 0x43d   :  { %2324 = vmatpush3.bf16.xpose.msra.mxu1 %v522_v19  ;;  %2325 = vmatprep.mubr.msk.bf16.mxu1 %vm2718_vm2, %v2717_v23 }
 0x43e   :  { %2329 = vmatprep.subr.bf16.mxu1 %v2717_v23 }
 0x444   :  { %2326 = vmatmul.mubr.msk.bf16.vlgmr.msra.gmra.mrb[16].mxu1 %vm367_vm3, %v2990_v9 }
 0x445   :  { %2330 = vmatpush3.bf16.msra.mxu1 %v627_v20  ;;  %2331 = vmatprep.mubr.msk.bf16.mxu1 %vm2718_vm2, %v2717_v23 }
 0x446   :  { %2335 = vmatprep.subr.bf16.mxu1 %v2717_v23 }
 0x498   :  { %v408_v22 = vpop.f32.mrb[4].mxu1 }
 0x499   :  { %v409_v25 = vadd.f32 %v408_v22, %v3022_v21  ;;  %v2309_v26 = vpop.f32.mrb[5].mxu1 }
 0x49a   :  { %v411_v27 = vpop.f32.mrb[6].mxu1 }
 0x49b   :  { %v565_v28 = vmul.f32 1.442695, %v409_v25  ;;  %v412_v29 = vadd.f32 %v411_v27, %v3027_v24  ;;  %v2310_v30 = vpop.f32.mrb[7].mxu1 }
 0x49d   :  { %2624 = vpow2.f32 %v565_v28  ;;  %v567_v31 = vmul.f32 1.442695, %v412_v29 }
 0x49f   :  { %2626 = vpow2.f32 %v567_v31 }
 0x4a7   :  { %v3031_v32 = vpop.eup %2624 }
 0x4a8   :  { %v582_v33 = vsel %vm581_vm4, %v3031_v32, 0.0 }
 0x4a9   :  { %v2627_v34 = vpop.eup %2626  ;;  %583 = vadd.xlane.f32.xlu1 %v582_v33 }
 0x4aa   :  { %v585_v35 = vsel %vm581_vm4, %v2627_v34, 0.0 }
 0x4ab   :  { %586 = vadd.xlane.f32.xlu0 %v585_v35 }
 0x507   :  { %v458_v36 = vpop.f32.mrb[8].mxu1 }
 0x508   :  { %v459_v37 = vadd.f32 %v458_v36, %v3022_v21  ;;  %v2315_v38 = vpop.f32.mrb[9].mxu1 }
 0x509   :  { %v461_v39 = vpop.f32.mrb[10].mxu1 }
 0x50a   :  { %v569_v40 = vmul.f32 1.442695, %v459_v37  ;;  %v462_v41 = vadd.f32 %v461_v39, %v3027_v24  ;;  %v2316_v42 = vpop.f32.mrb[11].mxu1 }
 0x50c   :  { %2628 = vpow2.f32 %v569_v40  ;;  %v571_v43 = vmul.f32 1.442695, %v462_v41 }
 0x50e   :  { %2630 = vpow2.f32 %v571_v43 }
 0x50f   :  { %v508_v44 = vpop.f32.mrb[12].mxu1 }
 0x510   :  { %v509_v45 = vadd.f32 %v508_v44, %v3022_v21  ;;  %v2321_v46 = vpop.f32.mrb[13].mxu1 }
 0x511   :  { %v511_v47 = vpop.f32.mrb[14].mxu1 }
 0x512   :  { %v573_v48 = vmul.f32 1.442695, %v509_v45  ;;  %v512_v49 = vadd.f32 %v511_v47, %v3027_v24  ;;  %v2322_v50 = vpop.f32.mrb[15].mxu1 }
 0x514   :  { %2632 = vpow2.f32 %v573_v48  ;;  %v575_v51 = vmul.f32 1.442695, %v512_v49 }
 0x516   :  { %v2629_v52 = vpop.eup %2628  ;;  %2634 = vpow2.f32 %v575_v51 }
 0x517   :  { %v558_v53 = vpop.f32.mrb[16].mxu1  ;;  %v588_v54 = vsel %vm581_vm4, %v2629_v52, 0.0 }
 0x518   :  { %v2631_v55 = vpop.eup %2630  ;;  %v559_v56 = vadd.f32 %v558_v53, %v3022_v21  ;;  %589 = vadd.xlane.f32.xlu0 %v588_v54  ;;  %v2327_v57 = vpop.f32.mrb[17].mxu1  ;;  %v2590_v53 = vld [vmem:[%s3400_s10] sm:$0xff]  }
 0x519   :  { %v561_v58 = vpop.f32.mrb[18].mxu1  ;;  %v591_v62 = vsel %vm581_vm4, %v2631_v55, 0.0 }
 0x51a   :  { %v577_v59 = vmul.f32 1.442695, %v559_v56  ;;  %v562_v60 = vadd.f32 %v561_v58, %v3027_v24  ;;  %v2328_v61 = vpop.f32.mrb[19].mxu1  ;;  %v2591_v56 = vld [vmem:[%s3400_s10 + $0x8] sm:$0xff]  }
 0x51c   :  { %2636 = vpow2.f32 %v577_v59  ;;  %v579_v63 = vmul.f32 1.442695, %v562_v60  ;;  %592 = vadd.xlane.f32.xlu0 %v591_v62 }
 0x51e   :  { %v2633_v0 = vpop.eup %2632  ;;  %2638 = vpow2.f32 %v579_v63 }
 0x51f   :  { %v594_v1 = vsel %vm581_vm4, %v2633_v0, 0.0 }
 0x520   :  { %v2635_v2 = vpop.eup %2634  ;;  %595 = vadd.xlane.f32.xlu1 %v594_v1 }
 0x521   :  { %v597_v3 = vsel %vm581_vm4, %v2635_v2, 0.0 }
 0x522   :  { %598 = vadd.xlane.f32.xlu0 %v597_v3 }
 0x526   :  { %v2637_v6 = vpop.eup %2636 }
 0x527   :  { %v600_v7 = vsel %vm581_vm4, %v2637_v6, 0.0 }
 0x528   :  { %v2639_v8 = vpop.eup %2638  ;;  %601 = vadd.xlane.f32.xlu1 %v600_v7 }
 0x529   :  { %v603_v10 = vsel %vm581_vm4, %v2639_v8, 0.0 }
 0x52a   :  { %604 = vadd.xlane.f32.xlu0 %v603_v10 }
 0x536   :  { %v584_v11 = vpop.xlane.xlu1 %583 }
 0x537   :  { %2640 = vrcp.f32 %v584_v11 }
 0x538   :  { %v587_v12 = vpop.xlane.xlu0 %586 }
 0x539   :  { %2642 = vrcp.f32 %v587_v12  ;;  %720 = vrot.lane.b32.xlu1 %v2982_v4, %s2723_s22 }
 0x53d   :  { %767 = vrot.lane.b32.xlu1 %v2990_v9, %s2723_s22 }
 0x540   :  { %673 = vrot.lane.b32.xlu0 %v2984_v5, %s2723_s22 }
 0x541   :  { %v2641_v14 = vpop.eup %2640 }
 0x542   :  { %v614_v16 = vmul.f32 %v2641_v14, %v3031_v32 }
 0x543   :  { %v2643_v15 = vpop.eup %2642 }
 0x544   :  { %v615_v17 = vmul.f32 %v2643_v15, %v2627_v34 }
 0x546   :  { %v622_v19 = vpack.c.bf16 %v615_v17, %v614_v16 }
 0x548   :  { %2332 = vmatmul.mubr.msk.bf16.vlgmr.msra.gmra.mrb[20].mxu1 %vm581_vm4, %v622_v19 }
 0x549   :  { %2337 = vmatprep.mubr.msk.bf16.mxu1 %vm2718_vm2, %v2717_v23 }
 0x5a5   :  { %v590_v20 = vpop.xlane.xlu0 %589 }
 0x5a9   :  { %v593_v22 = vpop.xlane.xlu0 %592 }
 0x5aa   :  { %2644 = vrcp.f32 %v593_v22 }
 0x5ab   :  { %2646 = vrcp.f32 %v590_v20 }
 0x5ad   :  { %v596_v9 = vpop.xlane.xlu1 %595 }
 0x5af   :  { %v599_v4 = vpop.xlane.xlu0 %598 }
 0x5b0   :  { %2648 = vrcp.f32 %v599_v4 }
 0x5b1   :  { %2650 = vrcp.f32 %v596_v9  ;;  %v2140_v9 = vld [vmem:[%s3401_s11] ss:$0 sm:$0xff] }
 0x5b4   :  { %v2645_v25 = vpop.eup %2644 }
 0x5b5   :  { %v2647_v26 = vpop.eup %2646  ;;  %v617_v27 = vmul.f32 %v2645_v25, %v2631_v55  ;;  %v602_v28 = vpop.xlane.xlu1 %601 }
 0x5b6   :  { %v616_v29 = vmul.f32 %v2647_v26, %v2629_v52 }
 0x5b7   :  { %v605_v5 = vpop.xlane.xlu0 %604 }
 0x5b8   :  { %2652 = vrcp.f32 %v605_v5  ;;  %v623_v31 = vpack.c.bf16 %v617_v27, %v616_v29 }
 0x5b9   :  { %2654 = vrcp.f32 %v602_v28  ;;  %v721_v33 = vpop.permute.xlu1 %720 }
 0x5ba   :  { %v2649_v32 = vpop.eup %2648 }
 0x5bb   :  { %v674_v30 = vpop.permute.xlu0 %673  ;;  %v2651_v34 = vpop.eup %2650  ;;  %v619_v35 = vmul.f32 %v2649_v32, %v2635_v2 }
 0x5bc   :  { %2336 = vmatpush3.bf16.msra.mxu1 %v674_v30  ;;  %v618_v36 = vmul.f32 %v2651_v34, %v2633_v0 }
 0x5bd   :  { %2341 = vmatprep.subr.bf16.mxu1 %v2717_v23  ;;  %v768_v39 = vpop.permute.xlu1 %767 }
 0x5be   :  { %v624_v37 = vpack.c.bf16 %v619_v35, %v618_v36  ;;  %v2592_v35 = vld [vmem:[%s3402_s14] sm:$0xff]   ;;  %v2593_v36 = vld [vmem:[%s3402_s14 + $0x8] sm:$0xff]  }
 0x5bf   :  { %2338 = vmatmul.mubr.msk.bf16.vlgmr.msra.gmra.mrb[24].mxu1 %vm581_vm4, %v623_v31  ;;  %2362 = vmatpush3.bf16.msra.mxu0 %v2592_v35 }
 0x5c0   :  { %2342 = vmatpush3.bf16.msra.mxu1 %v721_v33  ;;  %2343 = vmatprep.mubr.msk.bf16.mxu1 %vm2718_vm2, %v2717_v23 }
 0x5c1   :  { %2347 = vmatprep.subr.bf16.mxu1 %v2717_v23  ;;  %2363 = vmatprep.subr.bf16.mxu0 %v2717_v23 }
 0x5c2   :  { %v2653_v38 = vpop.eup %2652 }
 0x5c3   :  { %v2655_v40 = vpop.eup %2654  ;;  %v621_v41 = vmul.f32 %v2653_v38, %v2639_v8  ;;  %2364 = vmatpush3.bf16.msra.mxu0 %v2593_v36 }
 0x5c4   :  { %v620_v42 = vmul.f32 %v2655_v40, %v2637_v6  ;;  %2389 = vmatprep.subr.bf16.mxu0 %v2717_v23 }
 0x5c6   :  { %v625_v43 = vpack.c.bf16 %v621_v41, %v620_v42 }
 0x5c7   :  { %2344 = vmatmul.mubr.msk.bf16.vlgmr.msra.gmra.mrb[28].mxu1 %vm581_vm4, %v624_v37 }
 0x5c8   :  { %2348 = vmatpush3.bf16.msra.mxu1 %v768_v39  ;;  %2349 = vmatprep.mubr.msk.bf16.mxu1 %vm2718_vm2, %v2717_v23 }
 0x5c9   :  { %2353 = vmatprep.subr.bf16.mxu1 %v2717_v23 }
 0x5cf   :  { %2350 = vmatmul.mubr.msk.bf16.vlgmr.msra.gmra.mrb[32].mxu1 %vm581_vm4, %v625_v43 }
 0x5d0   :  { %2357 = vmatprep.mubr.msk.bf16.mxu1 %vm2718_vm2, %v2717_v23  ;;  %2354 = vmatpush3.bf16.msra.mxu1 %v2590_v53 }
 0x5d1   :  { %2355 = vmatprep.subr.bf16.mxu1 %v2717_v23 }
 0x5d4   :  { %2356 = vmatpush3.bf16.msra.mxu1 %v2591_v56 }
 0x5d5   :  { %2369 = vmatprep.subr.bf16.mxu1 %v2717_v23 }
 0x61b   :  { %v666_v44 = vpop.f32.mrb[20].mxu1 }
 0x61c   :  { %v2333_v45 = vpop.f32.mrb[21].mxu1 }
 0x61d   :  { %v669_v46 = vpop.f32.mrb[22].mxu1 }
 0x61e   :  { %v2334_v47 = vpop.f32.mrb[23].mxu1 }
 0x692   :  { %v713_v48 = vpop.f32.mrb[24].mxu1 }
 0x693   :  { %v2339_v49 = vpop.f32.mrb[25].mxu1 }
 0x694   :  { %v716_v50 = vpop.f32.mrb[26].mxu1 }
 0x695   :  { %v2543_v51 = vpack.i.bf16 %v716_v50, %v713_v48  ;;  %v2340_v52 = vpop.f32.mrb[27].mxu1 }
 0x697   :  { %2544 = vrot.lane.b32.xlu1 %v2543_v51, %s2724_s25 }
 0x69a   :  { %v760_v54 = vpop.f32.mrb[28].mxu1 }
 0x69b   :  { %v2345_v55 = vpop.f32.mrb[29].mxu1 }
 0x69c   :  { %v763_v57 = vpop.f32.mrb[30].mxu1 }
 0x69d   :  { %v2548_v58 = vpack.i.bf16 %v763_v57, %v760_v54  ;;  %v2346_v59 = vpop.f32.mrb[31].mxu1  ;;  %v2141_v54 = vld [vmem:[%s3403_s12] ss:$0 sm:$0xff] }
 0x69e   :  { %v2142_v59 = vld [vmem:[%s3404_s13] ss:$0 sm:$0xff] }
 0x69f   :  { %2549 = vrot.lane.b32.xlu0 %v2548_v58, %s2725_s28 }
 0x6a2   :  { %v807_v60 = vpop.f32.mrb[32].mxu1 }
 0x6a3   :  { %v2351_v61 = vpop.f32.mrb[33].mxu1 }
 0x6a4   :  { %v810_v62 = vpop.f32.mrb[34].mxu1 }
 0x6a5   :  { %v2553_v63 = vpack.i.bf16 %v810_v62, %v807_v60  ;;  %v2352_v0 = vpop.f32.mrb[35].mxu1 }
 0x6a6   :  { %v2594_v0 = vld [vmem:[%s3405_s16] sm:$0xff]  }
 0x6a7   :  { %2554 = vrot.lane.b32.xlu1 %v2553_v63, %s2726_s30 }
 0x709   :  { %v2545_v1 = vpop.permute.xlu1 %2544 }
 0x70a   :  { %v2547_v3 = vunpack.i.h.bf16 %v2545_v1  ;;  %v2546_v6 = vunpack.i.l.bf16 %v2545_v1  ;;  %v2595_v1 = vld [vmem:[%s3405_s16 + $0x8] sm:$0xff]  }
 0x70c   :  { %v839_v11 = vsel %vm367_vm3, %v669_v46, %v2547_v3  ;;  %v838_v12 = vsel %vm367_vm3, %v666_v44, %v2546_v6  ;;  %v2597_v3 = vld [vmem:[%s3405_s16 + $0x18] sm:$0xff]   ;;  %v2598_v6 = vld [vmem:[%s3405_s16 + $0x20] sm:$0xff]  }
 0x711   :  { %v2550_v2 = vpop.permute.xlu0 %2549 }
 0x712   :  { %v2552_v7 = vunpack.i.h.bf16 %v2550_v2  ;;  %v2551_v8 = vunpack.i.l.bf16 %v2550_v2  ;;  %v2596_v2 = vld [vmem:[%s3405_s16 + $0x10] sm:$0xff]  }
 0x714   :  { %v841_v16 = vsel %vm581_vm4, %v839_v11, %v2552_v7  ;;  %v840_v17 = vsel %vm581_vm4, %v838_v12, %v2551_v8  ;;  %v2599_v7 = vld [vmem:[%s3405_s16 + $0x28] sm:$0xff]   ;;  %v2600_v8 = vld [vmem:[%s3405_s16 + $0x30] sm:$0xff]   ;;  %v2143_v11 = vld [vmem:[%s3406_s15] ss:$0 sm:$0xff] }
 0x719   :  { %v2555_v10 = vpop.permute.xlu1 %2554 }
 0x71a   :  { %v2557_v14 = vunpack.i.h.bf16 %v2555_v10  ;;  %v2556_v15 = vunpack.i.l.bf16 %v2555_v10  ;;  %v2601_v10 = vld [vmem:[%s3405_s16 + $0x38] sm:$0xff]  }
 0x71c   :  { %v844_v19 = vsel %vm842_vm5, %v841_v16, %v2557_v14  ;;  %v843_v20 = vsel %vm842_vm5, %v840_v17, %v2556_v15 }
 0x71d   :  { %v845_v22 = vpack.c.bf16 %v844_v19, %v843_v20 }
 0x71f   :  { %2358 = vmatmul.mubr.msk.bf16.vlgmr.msra.gmra.mrb[36].mxu1 %vm174_vm1, %v845_v22 }
 0x720   :  { %2385 = vmatprep.mubr.msk.bf16.mxu1 %vm2718_vm2, %v2717_v23  ;;  %2370 = vmatpush3.bf16.msra.mxu1 %v2594_v0  ;;  %v2160_v0 = vld [vmem:[%s3396_s6 + $0x1] ss:$0 sm:$0xff] }
 0x721   :  { %2371 = vmatprep.subr.bf16.mxu1 %v2717_v23 }
 0x724   :  { %2372 = vmatpush3.bf16.msra.mxu1 %v2595_v1 }
 0x725   :  { %2373 = vmatprep.subr.bf16.mxu1 %v2717_v23 }
 0x728   :  { %2374 = vmatpush3.bf16.msra.mxu1 %v2596_v2 }
 0x729   :  { %2375 = vmatprep.subr.bf16.mxu1 %v2717_v23 }
 0x72c   :  { %2376 = vmatpush3.bf16.msra.mxu1 %v2597_v3 }
 0x72d   :  { %2377 = vmatprep.subr.bf16.mxu1 %v2717_v23 }
 0x730   :  { %2378 = vmatpush3.bf16.msra.mxu1 %v2598_v6  ;;  %v2161_v6 = vld [vmem:[%s3397_s7 + $0x1] ss:$0 sm:$0xff] }
 0x731   :  { %2379 = vmatprep.subr.bf16.mxu1 %v2717_v23 }
 0x734   :  { %2380 = vmatpush3.bf16.msra.mxu1 %v2599_v7 }
 0x735   :  { %2381 = vmatprep.subr.bf16.mxu1 %v2717_v23 }
 0x738   :  { %2382 = vmatpush3.bf16.msra.mxu1 %v2600_v8 }
 0x739   :  { %2383 = vmatprep.subr.bf16.mxu1 %v2717_v23 }
 0x73c   :  { %2384 = vmatpush3.bf16.msra.mxu1 %v2601_v10 }
 0x73d   :  { %2415 = vmatprep.subr.bf16.mxu1 %v2717_v23 }
 0x7f2   :  { %v899_v4 = vpop.f32.mrb[36].mxu1 }
 0x7f3   :  { %v906_v25 = vadd.f32 %v899_v4, %v2936_v13  ;;  %v2359_v5 = vpop.f32.mrb[37].mxu1 }
 0x7f4   :  { %v902_v26 = vpop.f32.mrb[38].mxu1 }
 0x7f5   :  { %v3094_v27 = vadd.f32 %v2140_v9, %v906_v25  ;;  %v907_v28 = vadd.f32 %v902_v26, %v2942_v18  ;;  %v2360_v29 = vpop.f32.mrb[39].mxu1 }
 0x7f7   :  { %v3097_v30 = vadd.f32 %v2140_v9, %v907_v28  ;;  %v919_v31 = vsel %vm174_vm1, %v3094_v27, 0.0  ;;  %v927_v32 = vmul.f32 %v3094_v27, %v3094_v27 }
 0x7f8   :  { %920 = vadd.xlane.f32.xlu0 %v919_v31 }
 0x7f9   :  { %v922_v33 = vsel %vm174_vm1, %v3097_v30, 0.0  ;;  %v929_v13 = vsel %vm174_vm1, %v927_v32, 0.0  ;;  %v928_v34 = vmul.f32 %v3097_v30, %v3097_v30 }
 0x7fa   :  { %923 = vadd.xlane.f32.xlu1 %v922_v33 }
 0x7fb   :  { %v932_v18 = vsel %vm174_vm1, %v928_v34, 0.0  ;;  %v2149_v34 = vld [vmem:[%s3407_s17] ss:$0 sm:$0xff] }
 0x7fc   :  { %930 = vadd.xlane.f32.xlu0 %v929_v13 }
 0x800   :  { %933 = vadd.xlane.f32.xlu0 %v932_v18 }
 0x885   :  { %v921_v37 = vpop.xlane.xlu0 %920 }
 0x886   :  { %v925_v38 = vmul.f32 0.03125, %v921_v37 }
 0x887   :  { %v924_v39 = vpop.xlane.xlu1 %923 }
 0x888   :  { %v939_v41 = vmul.f32 %v925_v38, %v925_v38  ;;  %v926_v42 = vmul.f32 0.03125, %v924_v39  ;;  %v937_v51 = vsub.f32 %v3094_v27, %v925_v38 }
 0x889   :  { %v931_v40 = vpop.xlane.xlu0 %930 }
 0x88a   :  { %v935_v43 = vmul.f32 0.03125, %v931_v40  ;;  %v940_v46 = vmul.f32 %v926_v42, %v926_v42  ;;  %v938_v55 = vsub.f32 %v3097_v30, %v926_v42 }
 0x88c   :  { %v941_v44 = vsub.f32 %v935_v43, %v939_v41 }
 0x88d   :  { %v934_v45 = vpop.xlane.xlu0 %933 }
 0x88e   :  { %v943_v47 = vadd.f32 1e-05, %v941_v44  ;;  %v936_v48 = vmul.f32 0.03125, %v934_v45 }
 0x890   :  { %2656 = vrsqrt.f32 %v943_v47  ;;  %v942_v49 = vsub.f32 %v936_v48, %v940_v46  ;;  %v2602_v46 = vld [vmem:[%s3395_s8 + $0x10] sm:$0xff]   ;;  %v2603_v47 = vld [vmem:[%s3395_s8 + $0x18] sm:$0xff]  }
 0x892   :  { %v944_v50 = vadd.f32 1e-05, %v942_v49 }
 0x894   :  { %2658 = vrsqrt.f32 %v944_v50 }
 0x89a   :  { %v2657_v52 = vpop.eup %2656 }
 0x89b   :  { %v947_v53 = vmul.f32 %v2657_v52, %v937_v51 }
 0x89d   :  { %v955_v57 = vmul.f32 %v2141_v54, %v947_v53 }
 0x89e   :  { %v2659_v56 = vpop.eup %2658 }
 0x89f   :  { %v948_v58 = vmul.f32 %v2659_v56, %v938_v55  ;;  %v963_v61 = vadd.f32 %v2142_v59, %v955_v57 }
 0x8a1   :  { %v956_v60 = vmul.f32 %v2141_v54, %v948_v58 }
 0x8a3   :  { %v964_v62 = vadd.f32 %v2142_v59, %v956_v60 }
 0x8a5   :  { %v965_v63 = vpack.c.bf16 %v964_v62, %v963_v61 }
 0x8a7   :  { %2366 = vmatmul.mubr.msk.bf16.vlgmr.msra.gmra.mrb[4].mxu0 %vm174_vm1, %v965_v63 }
 0x8a8   :  { %2393 = vmatprep.mubr.msk.bf16.mxu0 %vm2718_vm2, %v2717_v23  ;;  %2390 = vmatpush3.bf16.msra.mxu0 %v2602_v46 }
 0x8a9   :  { %2391 = vmatprep.subr.bf16.mxu0 %v2717_v23 }
 0x8ac   :  { %2392 = vmatpush3.bf16.msra.mxu0 %v2603_v47 }
 0x8ad   :  { %2397 = vmatprep.subr.bf16.mxu0 %v2717_v23 }
 0x97a   :  { %v1026_v12 = vpop.f32.mrb[4].mxu0 }
 0x97b   :  { %v1027_v14 = vadd.f32 %v2143_v11, %v1026_v12  ;;  %v2367_v15 = vpop.f32.mrb[5].mxu0 }
 0x97c   :  { %v1029_v16 = vpop.f32.mrb[6].mxu0  ;;  %v2167_v15 = vld [vmem:[%s3398_s9 + $0x1] ss:$0 sm:$0xff] }
 0x97d   :  { %v2147_v17 = vmul.f32 -1.702, %v1027_v14  ;;  %v1030_v19 = vadd.f32 %v2143_v11, %v1029_v16  ;;  %v2368_v20 = vpop.f32.mrb[7].mxu0 }
 0x97f   :  { %v1037_v22 = vmul.f32 1.442695, %v2147_v17  ;;  %v2148_v4 = vmul.f32 -1.702, %v1030_v19 }
 0x981   :  { %2660 = vpow2.f32 %v1037_v22  ;;  %v1039_v9 = vmul.f32 1.442695, %v2148_v4 }
 0x983   :  { %2662 = vpow2.f32 %v1039_v9 }
 0x98b   :  { %v2661_v25 = vpop.eup %2660 }
 0x98c   :  { %v1041_v5 = vadd.f32 1.0, %v2661_v25 }
 0x98d   :  { %v2663_v26 = vpop.eup %2662 }
 0x98e   :  { %2664 = vrcp.f32 %v1041_v5  ;;  %v1042_v28 = vadd.f32 1.0, %v2663_v26 }
 0x990   :  { %2666 = vrcp.f32 %v1042_v28 }
 0x998   :  { %v2665_v29 = vpop.eup %2664 }
 0x999   :  { %v1047_v32 = vmul.f32 %v2665_v29, %v1027_v14 }
 0x99a   :  { %v2667_v31 = vpop.eup %2666 }
 0x99b   :  { %v1048_v33 = vmul.f32 %v2667_v31, %v1030_v19 }
 0x99d   :  { %v1049_v13 = vpack.c.bf16 %v1048_v33, %v1047_v32 }
 0x99f   :  { %2386 = vmatmul.mubr.bf16.vlgmr.msra.gmra.mrb[40].mxu1 %v1049_v13 }
 0x9a0   :  { %2417 = vmatprep.mubr.msk.bf16.mxu1 %vm2718_vm2, %v2717_v23 }
 0xa72   :  { %v1155_v18 = vpop.f32.mrb[40].mxu1 }
 0xa73   :  { %v1156_v35 = vadd.f32 %v2149_v34, %v1155_v18  ;;  %v2387_v36 = vpop.f32.mrb[41].mxu1 }
 0xa74   :  { %v1158_v37 = vpop.f32.mrb[42].mxu1 }
 0xa75   :  { %v3169_v38 = vadd.f32 %v1156_v35, %v3094_v27  ;;  %v1159_v39 = vadd.f32 %v2149_v34, %v1158_v37  ;;  %v2388_v40 = vpop.f32.mrb[43].mxu1 }
 0xa77   :  { %v3172_v41 = vadd.f32 %v1159_v39, %v3097_v30  ;;  %v1168_v42 = vsel %vm174_vm1, %v3169_v38, 0.0  ;;  %v1176_v43 = vmul.f32 %v3169_v38, %v3169_v38 }
 0xa78   :  { %1169 = vadd.xlane.f32.xlu0 %v1168_v42 }
 0xa79   :  { %v1171_v44 = vsel %vm174_vm1, %v3172_v41, 0.0  ;;  %v1177_v45 = vmul.f32 %v3172_v41, %v3172_v41  ;;  %v1178_v27 = vsel %vm174_vm1, %v1176_v43, 0.0 }
 0xa7a   :  { %1172 = vadd.xlane.f32.xlu1 %v1171_v44 }
 0xa7b   :  { %v1181_v30 = vsel %vm174_vm1, %v1177_v45, 0.0 }
 0xa7c   :  { %1179 = vadd.xlane.f32.xlu0 %v1178_v27 }
 0xa7e   :  { %1182 = vadd.xlane.f32.xlu1 %v1181_v30 }
 0xb05   :  { %v1170_v48 = vpop.xlane.xlu0 %1169 }
 0xb06   :  { %v1174_v49 = vmul.f32 0.03125, %v1170_v48 }
 0xb07   :  { %v1173_v50 = vpop.xlane.xlu1 %1172 }
 0xb08   :  { %v1175_v51 = vmul.f32 0.03125, %v1173_v50  ;;  %v1188_v53 = vmul.f32 %v1174_v49, %v1174_v49  ;;  %v1186_v62 = vsub.f32 %v3169_v38, %v1174_v49 }
 0xb09   :  { %v1180_v52 = vpop.xlane.xlu0 %1179 }
 0xb0a   :  { %v1184_v54 = vmul.f32 0.03125, %v1180_v52  ;;  %v1189_v56 = vmul.f32 %v1175_v51, %v1175_v51  ;;  %v1187_v1 = vsub.f32 %v3172_v41, %v1175_v51 }
 0xb0b   :  { %v1183_v55 = vpop.xlane.xlu1 %1182 }
 0xb0c   :  { %v1190_v57 = vsub.f32 %v1184_v54, %v1188_v53  ;;  %v1185_v58 = vmul.f32 0.03125, %v1183_v55 }
 0xb0e   :  { %v1192_v59 = vadd.f32 1e-05, %v1190_v57  ;;  %v1191_v60 = vsub.f32 %v1185_v58, %v1189_v56 }
 0xb10   :  { %2668 = vrsqrt.f32 %v1192_v59  ;;  %v1193_v61 = vadd.f32 1e-05, %v1191_v60 }
 0xb12   :  { %2670 = vrsqrt.f32 %v1193_v61 }
 0xb1a   :  { %v2669_v63 = vpop.eup %2668 }
 0xb1b   :  { %v1196_v2 = vmul.f32 %v2669_v63, %v1186_v62 }
 0xb1c   :  { %v2671_v3 = vpop.eup %2670 }
 0xb1d   :  { %v1197_v7 = vmul.f32 %v2671_v3, %v1187_v1  ;;  %v1204_v8 = vmul.f32 %v2160_v0, %v1196_v2 }
 0xb1f   :  { %v1205_v10 = vmul.f32 %v2160_v0, %v1197_v7  ;;  %v1212_v11 = vadd.f32 %v2161_v6, %v1204_v8 }
 0xb21   :  { %v1213_v12 = vadd.f32 %v2161_v6, %v1205_v10 }
 0xb23   :  { %v1214_v14 = vpack.c.bf16 %v1213_v12, %v1212_v11 }
 0xb25   :  { %2394 = vmatmul.mubr.msk.bf16.vlgmr.msra.gmra.mrb[8].mxu0 %vm174_vm1, %v1214_v14 }
 0xb26   :  { %2399 = vmatprep.mubr.msk.bf16.mxu0 %vm2718_vm2, %v2717_v23 }
 0xbf8   :  { %v1277_v16 = vpop.f32.mrb[8].mxu0 }
 0xbf9   :  { %v2395_v17 = vpop.f32.mrb[9].mxu0  ;;  %v1278_v20 = vadd.f32 %v2167_v15, %v1277_v16 }
 0xbfa   :  { %v1280_v19 = vpop.f32.mrb[10].mxu0 }
 0xbfb   :  { %v1281_v22 = vadd.f32 %v2167_v15, %v1280_v19  ;;  %v2396_v4 = vpop.f32.mrb[11].mxu0 }
 0xbfd   :  { %v2563_v9 = vpack.i.bf16 %v1281_v22, %v1278_v20  ;;  %v1304_v25 = vpack.c.bf16 %v1281_v22, %v1278_v20 }
 0xbff   :  { %2564 = vrot.lane.b32.xlu1 %v2563_v9, %s2719_s0  ;;  %2559 = vrot.lane.b32.xlu0 %v2563_v9, %s2720_s20 }
 0xc03   :  { %2569 = vrot.lane.b32.xlu1 %v2563_v9, %s2721_s21 }
 0xc07   :  { %1309 = vrot.lane.b32.xlu1 %v1304_v25, %s2722_s19 }
 0xc71   :  { %v2565_v5 = vpop.permute.xlu1 %2564  ;;  %v2560_v26 = vpop.permute.xlu0 %2559 }
 0xc72   :  { %v2567_v28 = vunpack.i.h.bf16 %v2565_v5  ;;  %v2566_v29 = vunpack.i.l.bf16 %v2565_v5  ;;  %v2562_v31 = vunpack.i.h.bf16 %v2560_v26  ;;  %v2561_v32 = vunpack.i.l.bf16 %v2560_v26 }
 0xc74   :  { %v3210_v33 = vpack.c.bf16 %v2567_v28, %v2566_v29  ;;  %v3212_v13 = vpack.c.bf16 %v2562_v31, %v2561_v32 }
 0xc75   :  { %v2570_v34 = vpop.permute.xlu1 %2569 }
 0xc76   :  { %v2572_v18 = vunpack.i.h.bf16 %v2570_v34  ;;  %v2571_v35 = vunpack.i.l.bf16 %v2570_v34  ;;  %1359 = vrot.lane.b32.xlu0 %v3212_v13, %s2722_s19  ;;  %1409 = vrot.lane.b32.xlu1 %v3210_v33, %s2722_s19 }
 0xc78   :  { %v3218_v36 = vpack.c.bf16 %v2572_v18, %v2571_v35 }
 0xc79   :  { %v1310_v37 = vpop.permute.xlu1 %1309 }
 0xc7a   :  { %v1315_v39 = vsel %vm367_vm3, %v1310_v37, 0  ;;  %1459 = vrot.lane.b32.xlu0 %v3218_v36, %s2722_s19  ;;  %1568 = vrot.lane.b32.xlu1 %v1304_v25, %s2723_s22 }
 0xc7b   :  { %2398 = vmatpush3.bf16.xpose.msra.mxu0 %v1315_v39 }
 0xc7c   :  { %2403 = vmatprep.subr.bf16.mxu0 %v2717_v23 }
 0xc82   :  { %2400 = vmatmul.mubr.msk.bf16.vlgmr.msra.gmra.mrb[12].mxu0 %vm367_vm3, %v1304_v25 }
 0xc83   :  { %2405 = vmatprep.mubr.msk.bf16.mxu0 %vm2718_vm2, %v2717_v23 }
 0xce8   :  { %v1360_v40 = vpop.permute.xlu0 %1359  ;;  %v1410_v45 = vpop.permute.xlu1 %1409 }
 0xce9   :  { %v1365_v42 = vsel %vm367_vm3, %v1360_v40, 0  ;;  %v1415_v27 = vsel %vm367_vm3, %v1410_v45, 0 }
 0xcea   :  { %2404 = vmatpush3.bf16.xpose.msra.mxu0 %v1365_v42 }
 0xceb   :  { %2409 = vmatprep.subr.bf16.mxu0 %v2717_v23 }
 0xcec   :  { %v1460_v43 = vpop.permute.xlu0 %1459  ;;  %v1569_v30 = vpop.permute.xlu1 %1568 }
 0xced   :  { %v1465_v44 = vsel %vm367_vm3, %v1460_v43, 0 }
 0xcee   :  { %2416 = vmatpush3.bf16.xpose.msra.mxu1 %v1465_v44 }
 0xcef   :  { %2427 = vmatprep.subr.bf16.mxu1 %v2717_v23 }
 0xcf1   :  { %2406 = vmatmul.mubr.msk.bf16.vlgmr.msra.gmra.mrb[16].mxu0 %vm367_vm3, %v3212_v13 }
 0xcf2   :  { %2410 = vmatpush3.bf16.xpose.msra.mxu0 %v1415_v27  ;;  %2411 = vmatprep.mubr.msk.bf16.mxu0 %vm2718_vm2, %v2717_v23 }
 0xcf3   :  { %2421 = vmatprep.subr.bf16.mxu0 %v2717_v23 }
 0xcf5   :  { %2418 = vmatmul.mubr.msk.bf16.vlgmr.msra.gmra.mrb[44].mxu1 %vm367_vm3, %v3218_v36 }
 0xcf6   :  { %2429 = vmatprep.mubr.msk.bf16.mxu1 %vm2718_vm2, %v2717_v23 }
 0xcf9   :  { %2412 = vmatmul.mubr.msk.bf16.vlgmr.msra.gmra.mrb[20].mxu0 %vm367_vm3, %v3210_v33 }
 0xcfa   :  { %2422 = vmatpush3.bf16.msra.mxu0 %v1569_v30  ;;  %2423 = vmatprep.mubr.msk.bf16.mxu0 %vm2718_vm2, %v2717_v23 }
 0xcfb   :  { %2433 = vmatprep.subr.bf16.mxu0 %v2717_v23 }
 0xd55   :  { %v1351_v46 = vpop.f32.mrb[12].mxu0 }
 0xd56   :  { %v1352_v47 = vadd.f32 %v1351_v46, %v3022_v21  ;;  %v2401_v48 = vpop.f32.mrb[13].mxu0 }
 0xd57   :  { %v1354_v49 = vpop.f32.mrb[14].mxu0 }
 0xd58   :  { %v1508_v50 = vmul.f32 1.442695, %v1352_v47  ;;  %v1355_v51 = vadd.f32 %v1354_v49, %v3027_v24  ;;  %v2402_v52 = vpop.f32.mrb[15].mxu0 }
 0xd5a   :  { %2672 = vpow2.f32 %v1508_v50  ;;  %v1510_v53 = vmul.f32 1.442695, %v1355_v51 }
 0xd5c   :  { %2674 = vpow2.f32 %v1510_v53 }
 0xd64   :  { %v3249_v54 = vpop.eup %2672 }
 0xd65   :  { %v1524_v55 = vsel %vm581_vm4, %v3249_v54, 0.0 }
 0xd66   :  { %v2675_v56 = vpop.eup %2674  ;;  %1525 = vadd.xlane.f32.xlu1 %v1524_v55 }
 0xd67   :  { %v1527_v57 = vsel %vm581_vm4, %v2675_v56, 0.0 }
 0xd68   :  { %1528 = vadd.xlane.f32.xlu0 %v1527_v57 }
 0xdc4   :  { %v1401_v58 = vpop.f32.mrb[16].mxu0 }
 0xdc5   :  { %v1402_v59 = vadd.f32 %v1401_v58, %v3022_v21  ;;  %v2407_v60 = vpop.f32.mrb[17].mxu0 }
 0xdc6   :  { %v1404_v61 = vpop.f32.mrb[18].mxu0 }
 0xdc7   :  { %v1512_v62 = vmul.f32 1.442695, %v1402_v59  ;;  %v1405_v63 = vadd.f32 %v1404_v61, %v3027_v24  ;;  %v2408_v0 = vpop.f32.mrb[19].mxu0 }
 0xdc8   :  { %v1501_v1 = vpop.f32.mrb[44].mxu1 }
 0xdc9   :  { %2676 = vpow2.f32 %v1512_v62  ;;  %v1514_v2 = vmul.f32 1.442695, %v1405_v63  ;;  %v1502_v3 = vadd.f32 %v1501_v1, %v3022_v21  ;;  %v2419_v6 = vpop.f32.mrb[45].mxu1 }
 0xdca   :  { %v1504_v7 = vpop.f32.mrb[46].mxu1  ;;  %v2604_v6 = vld [vmem:[%s3400_s10 + $0x10] sm:$0xff]  }
 0xdcb   :  { %2678 = vpow2.f32 %v1514_v2  ;;  %v1520_v8 = vmul.f32 1.442695, %v1502_v3  ;;  %v1505_v10 = vadd.f32 %v1504_v7, %v3027_v24  ;;  %v2420_v11 = vpop.f32.mrb[47].mxu1 }
 0xdcc   :  { %v1451_v12 = vpop.f32.mrb[20].mxu0  ;;  %v2605_v11 = vld [vmem:[%s3400_s10 + $0x18] sm:$0xff]  }
 0xdcd   :  { %2680 = vpow2.f32 %v1520_v8  ;;  %v1522_v14 = vmul.f32 1.442695, %v1505_v10  ;;  %v1452_v15 = vadd.f32 %v1451_v12, %v3022_v21  ;;  %v2413_v16 = vpop.f32.mrb[21].mxu0 }
 0xdce   :  { %v1454_v17 = vpop.f32.mrb[22].mxu0 }
 0xdcf   :  { %2682 = vpow2.f32 %v1522_v14  ;;  %v1516_v19 = vmul.f32 1.442695, %v1452_v15  ;;  %v1455_v20 = vadd.f32 %v1454_v17, %v3027_v24  ;;  %v2414_v22 = vpop.f32.mrb[23].mxu0 }
 0xdd1   :  { %2684 = vpow2.f32 %v1516_v19  ;;  %v1518_v4 = vmul.f32 1.442695, %v1455_v20 }
 0xdd3   :  { %v2677_v9 = vpop.eup %2676  ;;  %2686 = vpow2.f32 %v1518_v4 }
 0xdd4   :  { %v1530_v25 = vsel %vm581_vm4, %v2677_v9, 0.0 }
 0xdd5   :  { %v2679_v5 = vpop.eup %2678  ;;  %1531 = vadd.xlane.f32.xlu0 %v1530_v25 }
 0xdd6   :  { %v1533_v28 = vsel %vm581_vm4, %v2679_v5, 0.0 }
 0xdd7   :  { %v2681_v26 = vpop.eup %2680 }
 0xdd8   :  { %v1542_v21 = vsel %vm581_vm4, %v2681_v26, 0.0 }
 0xdd9   :  { %v2683_v29 = vpop.eup %2682  ;;  %1534 = vadd.xlane.f32.xlu0 %v1533_v28  ;;  %1543 = vadd.xlane.f32.xlu1 %v1542_v21 }
 0xdda   :  { %v1545_v32 = vsel %vm581_vm4, %v2683_v29, 0.0 }
 0xddb   :  { %v2685_v31 = vpop.eup %2684 }
 0xddc   :  { %v1536_v24 = vsel %vm581_vm4, %v2685_v31, 0.0 }
 0xddd   :  { %v2687_v34 = vpop.eup %2686  ;;  %1537 = vadd.xlane.f32.xlu1 %v1536_v24  ;;  %1546 = vadd.xlane.f32.xlu0 %v1545_v32 }
 0xdde   :  { %v1539_v18 = vsel %vm581_vm4, %v2687_v34, 0.0 }
 0xde1   :  { %1540 = vadd.xlane.f32.xlu0 %v1539_v18 }
 0xdee   :  { %1662 = vrot.lane.b32.xlu1 %v3210_v33, %s2723_s22 }
 0xdf2   :  { %1709 = vrot.lane.b32.xlu1 %v3218_v36, %s2723_s22 }
 0xdf3   :  { %v1526_v35 = vpop.xlane.xlu1 %1525 }
 0xdf4   :  { %2688 = vrcp.f32 %v1526_v35 }
 0xdf5   :  { %v1529_v37 = vpop.xlane.xlu0 %1528 }
 0xdf6   :  { %2690 = vrcp.f32 %v1529_v37 }
 0xdf7   :  { %1615 = vrot.lane.b32.xlu0 %v3212_v13, %s2723_s22 }
 0xdfe   :  { %v2689_v39 = vpop.eup %2688 }
 0xdff   :  { %v1556_v42 = vmul.f32 %v2689_v39, %v3249_v54 }
 0xe00   :  { %v2691_v40 = vpop.eup %2690 }
 0xe01   :  { %v1557_v43 = vmul.f32 %v2691_v40, %v2675_v56 }
 0xe03   :  { %v1564_v44 = vpack.c.bf16 %v1557_v43, %v1556_v42 }
 0xe05   :  { %2424 = vmatmul.mubr.msk.bf16.vlgmr.msra.gmra.mrb[24].mxu0 %vm581_vm4, %v1564_v44 }
 0xe06   :  { %2435 = vmatprep.mubr.msk.bf16.mxu0 %vm2718_vm2, %v2717_v23 }
 0xe62   :  { %v1532_v33 = vpop.xlane.xlu0 %1531 }
 0xe63   :  { %2692 = vrcp.f32 %v1532_v33 }
 0xe66   :  { %v1535_v36 = vpop.xlane.xlu0 %1534  ;;  %v1544_v45 = vpop.xlane.xlu1 %1543 }
 0xe67   :  { %2694 = vrcp.f32 %v1535_v36  ;;  %v2187_v36 = vld [vmem:[%s3401_s11 + $0x1] ss:$0 sm:$0xff] }
 0xe68   :  { %2696 = vrcp.f32 %v1544_v45 }
 0xe6a   :  { %v1538_v27 = vpop.xlane.xlu1 %1537  ;;  %v1547_v30 = vpop.xlane.xlu0 %1546 }
 0xe6b   :  { %2698 = vrcp.f32 %v1547_v30 }
 0xe6c   :  { %2700 = vrcp.f32 %v1538_v27 }
 0xe6d   :  { %v2693_v47 = vpop.eup %2692 }
 0xe6e   :  { %v1663_v13 = vpop.permute.xlu1 %1662  ;;  %v1541_v46 = vpop.xlane.xlu0 %1540  ;;  %v1558_v49 = vmul.f32 %v2693_v47, %v2677_v9 }
 0xe6f   :  { %2702 = vrcp.f32 %v1541_v46  ;;  %2434 = vmatpush3.bf16.msra.mxu0 %v1663_v13 }
 0xe70   :  { %2445 = vmatprep.subr.bf16.mxu0 %v2717_v23 }
 0xe71   :  { %v2695_v48 = vpop.eup %2694 }
 0xe72   :  { %v1559_v50 = vmul.f32 %v2695_v48, %v2679_v5  ;;  %v1616_v51 = vpop.permute.xlu0 %1615  ;;  %v2697_v53 = vpop.eup %2696 }
 0xe73   :  { %2428 = vmatpush3.bf16.msra.mxu1 %v1616_v51  ;;  %v1710_v55 = vpop.permute.xlu1 %1709  ;;  %v1562_v59 = vmul.f32 %v2697_v53, %v2681_v26  ;;  %v2606_v53 = vld [vmem:[%s3402_s14 + $0x10] sm:$0xff]  }
 0xe74   :  { %v1565_v52 = vpack.c.bf16 %v1559_v50, %v1558_v49  ;;  %2439 = vmatprep.subr.bf16.mxu1 %v2717_v23 }
 0xe75   :  { %v2699_v54 = vpop.eup %2698 }
 0xe76   :  { %2430 = vmatmul.mubr.msk.bf16.vlgmr.msra.gmra.mrb[48].mxu1 %vm581_vm4, %v1565_v52  ;;  %v2701_v56 = vpop.eup %2700  ;;  %v1563_v57 = vmul.f32 %v2699_v54, %v2683_v29  ;;  %v2607_v54 = vld [vmem:[%s3402_s14 + $0x18] sm:$0xff]  }
 0xe77   :  { %2440 = vmatpush3.bf16.msra.mxu1 %v1710_v55  ;;  %2441 = vmatprep.mubr.msk.bf16.mxu1 %vm2718_vm2, %v2717_v23  ;;  %v1560_v60 = vmul.f32 %v2701_v56, %v2685_v31 }
 0xe78   :  { %2453 = vmatprep.subr.bf16.mxu1 %v2717_v23  ;;  %v1567_v63 = vpack.c.bf16 %v1563_v57, %v1562_v59 }
 0xe79   :  { %v2703_v58 = vpop.eup %2702 }
 0xe7a   :  { %v1561_v61 = vmul.f32 %v2703_v58, %v2687_v34 }
 0xe7c   :  { %v1566_v62 = vpack.c.bf16 %v1561_v61, %v1560_v60 }
 0xe7e   :  { %2436 = vmatmul.mubr.msk.bf16.vlgmr.msra.gmra.mrb[28].mxu0 %vm581_vm4, %v1566_v62  ;;  %2442 = vmatmul.mubr.msk.bf16.vlgmr.msra.gmra.mrb[52].mxu1 %vm581_vm4, %v1567_v63 }
 0xe7f   :  { %2449 = vmatprep.mubr.msk.bf16.mxu0 %vm2718_vm2, %v2717_v23  ;;  %2457 = vmatprep.mubr.msk.bf16.mxu1 %vm2718_vm2, %v2717_v23 }
 0xe80   :  { %2446 = vmatpush3.bf16.msra.mxu0 %v2604_v6  ;;  %2454 = vmatpush3.bf16.msra.mxu1 %v2606_v53 }
 0xe81   :  { %2447 = vmatprep.subr.bf16.mxu0 %v2717_v23  ;;  %2455 = vmatprep.subr.bf16.mxu1 %v2717_v23 }
 0xe84   :  { %2448 = vmatpush3.bf16.msra.mxu0 %v2605_v11  ;;  %2456 = vmatpush3.bf16.msra.mxu1 %v2607_v54  ;;  %v2190_v11 = vld [vmem:[%s3403_s12 + $0x1] ss:$0 sm:$0xff] }
 0xe85   :  { %2461 = vmatprep.subr.bf16.mxu0 %v2717_v23 }
 0xed8   :  { %v1608_v0 = vpop.f32.mrb[24].mxu0 }
 0xed9   :  { %v2425_v1 = vpop.f32.mrb[25].mxu0 }
 0xeda   :  { %v1611_v2 = vpop.f32.mrb[26].mxu0 }
 0xedb   :  { %v2426_v3 = vpop.f32.mrb[27].mxu0 }
 0xf49   :  { %v1655_v7 = vpop.f32.mrb[48].mxu1 }
 0xf4a   :  { %v2431_v8 = vpop.f32.mrb[49].mxu1 }
 0xf4b   :  { %v1658_v10 = vpop.f32.mrb[50].mxu1 }
 0xf4c   :  { %v2573_v12 = vpack.i.bf16 %v1658_v10, %v1655_v7  ;;  %v2432_v14 = vpop.f32.mrb[51].mxu1 }
 0xf4e   :  { %2574 = vrot.lane.b32.xlu1 %v2573_v12, %s2724_s25 }
 0xf51   :  { %v1702_v15 = vpop.f32.mrb[28].mxu0  ;;  %v1749_v16 = vpop.f32.mrb[52].mxu1 }
 0xf52   :  { %v2437_v17 = vpop.f32.mrb[29].mxu0  ;;  %v2443_v19 = vpop.f32.mrb[53].mxu1 }
 0xf53   :  { %v1705_v20 = vpop.f32.mrb[30].mxu0  ;;  %v1752_v22 = vpop.f32.mrb[54].mxu1  ;;  %v2191_v17 = vld [vmem:[%s3404_s13 + $0x1] ss:$0 sm:$0xff] }
 0xf54   :  { %v2578_v4 = vpack.i.bf16 %v1705_v20, %v1702_v15  ;;  %v2583_v9 = vpack.i.bf16 %v1752_v22, %v1749_v16  ;;  %v2438_v25 = vpop.f32.mrb[31].mxu0  ;;  %v2444_v5 = vpop.f32.mrb[55].mxu1 }
 0xf55   :  { %v2609_v25 = vld [vmem:[%s3405_s16 + $0x48] sm:$0xff]   ;;  %v2610_v5 = vld [vmem:[%s3405_s16 + $0x50] sm:$0xff]  }
 0xf56   :  { %2579 = vrot.lane.b32.xlu0 %v2578_v4, %s2725_s28  ;;  %2584 = vrot.lane.b32.xlu1 %v2583_v9, %s2726_s30  ;;  %v2608_v9 = vld [vmem:[%s3405_s16 + $0x40] sm:$0xff]  }
 0xfc0   :  { %v2575_v26 = vpop.permute.xlu1 %2574 }
 0xfc1   :  { %v2577_v28 = vunpack.i.h.bf16 %v2575_v26  ;;  %v2576_v21 = vunpack.i.l.bf16 %v2575_v26  ;;  %v2611_v26 = vld [vmem:[%s3405_s16 + $0x58] sm:$0xff]  }
 0xfc3   :  { %v1781_v35 = vsel %vm367_vm3, %v1611_v2, %v2577_v28  ;;  %v1780_v37 = vsel %vm367_vm3, %v1608_v0, %v2576_v21  ;;  %v2612_v28 = vld [vmem:[%s3405_s16 + $0x60] sm:$0xff]   ;;  %v2613_v21 = vld [vmem:[%s3405_s16 + $0x68] sm:$0xff]  }
 0xfc8   :  { %v2580_v29 = vpop.permute.xlu0 %2579  ;;  %v2585_v31 = vpop.permute.xlu1 %2584 }
 0xfc9   :  { %v2582_v24 = vunpack.i.h.bf16 %v2580_v29  ;;  %v2581_v32 = vunpack.i.l.bf16 %v2580_v29  ;;  %v2587_v34 = vunpack.i.h.bf16 %v2585_v31  ;;  %v2586_v18 = vunpack.i.l.bf16 %v2585_v31  ;;  %v2614_v29 = vld [vmem:[%s3405_s16 + $0x70] sm:$0xff]   ;;  %v2615_v31 = vld [vmem:[%s3405_s16 + $0x78] sm:$0xff]  }
 0xfcb   :  { %v1782_v39 = vsel %vm581_vm4, %v1780_v37, %v2581_v32  ;;  %v1783_v40 = vsel %vm581_vm4, %v1781_v35, %v2582_v24  ;;  %v2197_v24 = vld [vmem:[%s3406_s15 + $0x1] ss:$0 sm:$0xff] }
 0xfcc   :  { %v1785_v42 = vsel %vm842_vm5, %v1783_v40, %v2587_v34  ;;  %v1784_v43 = vsel %vm842_vm5, %v1782_v39, %v2586_v18 }
 0xfcd   :  { %v1786_v44 = vpack.c.bf16 %v1785_v42, %v1784_v43 }
 0xfcf   :  { %2450 = vmatmul.mubr.msk.bf16.vlgmr.msra.gmra.mrb[32].mxu0 %vm174_vm1, %v1786_v44 }
 0xfd0   :  { %2477 = vmatprep.mubr.msk.bf16.mxu0 %vm2718_vm2, %v2717_v23  ;;  %2462 = vmatpush3.bf16.msra.mxu0 %v2608_v9 }
 0xfd1   :  { %2463 = vmatprep.subr.bf16.mxu0 %v2717_v23 }
 0xfd4   :  { %2464 = vmatpush3.bf16.msra.mxu0 %v2609_v25 }
 0xfd5   :  { %2465 = vmatprep.subr.bf16.mxu0 %v2717_v23 }
 0xfd8   :  { %2466 = vmatpush3.bf16.msra.mxu0 %v2610_v5 }
 0xfd9   :  { %2467 = vmatprep.subr.bf16.mxu0 %v2717_v23 }
 0xfdc   :  { %2468 = vmatpush3.bf16.msra.mxu0 %v2611_v26 }
 0xfdd   :  { %2469 = vmatprep.subr.bf16.mxu0 %v2717_v23 }
 0xfe0   :  { %2470 = vmatpush3.bf16.msra.mxu0 %v2612_v28 }
 0xfe1   :  { %2471 = vmatprep.subr.bf16.mxu0 %v2717_v23 }
 0xfe4   :  { %2472 = vmatpush3.bf16.msra.mxu0 %v2613_v21 }
 0xfe5   :  { %2473 = vmatprep.subr.bf16.mxu0 %v2717_v23 }
 0xfe8   :  { %2474 = vmatpush3.bf16.msra.mxu0 %v2614_v29 }
 0xfe9   :  { %2475 = vmatprep.subr.bf16.mxu0 %v2717_v23 }
 0xfec   :  { %2476 = vmatpush3.bf16.msra.mxu0 %v2615_v31 }
0x10a2   :  { %v1841_v33 = vpop.f32.mrb[32].mxu0 }
0x10a3   :  { %v1848_v45 = vadd.f32 %v1841_v33, %v3169_v38  ;;  %v2451_v27 = vpop.f32.mrb[33].mxu0 }
0x10a4   :  { %v1844_v30 = vpop.f32.mrb[34].mxu0 }
0x10a5   :  { %v3312_v13 = vadd.f32 %v2187_v36, %v1848_v45  ;;  %v1849_v46 = vadd.f32 %v1844_v30, %v3172_v41  ;;  %v2452_v47 = vpop.f32.mrb[35].mxu0 }
0x10a7   :  { %v3315_v48 = vadd.f32 %v2187_v36, %v1849_v46  ;;  %v1864_v49 = vsel %vm174_vm1, %v3312_v13, 0.0  ;;  %v1872_v50 = vmul.f32 %v3312_v13, %v3312_v13 }
0x10a8   :  { %1865 = vadd.xlane.f32.xlu0 %v1864_v49 }
0x10a9   :  { %v1867_v51 = vsel %vm174_vm1, %v3315_v48, 0.0  ;;  %v1874_v38 = vsel %vm174_vm1, %v1872_v50, 0.0  ;;  %v1873_v52 = vmul.f32 %v3315_v48, %v3315_v48  ;;  %v2220_v50 = vld [vmem:[%s3407_s17 + $0x1] ss:$0 sm:$0xff] }
0x10aa   :  { %1868 = vadd.xlane.f32.xlu1 %v1867_v51 }
0x10ab   :  { %v1877_v41 = vsel %vm174_vm1, %v1873_v52, 0.0 }
0x10ac   :  { %1875 = vadd.xlane.f32.xlu0 %v1874_v38 }
0x10b0   :  { %1878 = vadd.xlane.f32.xlu0 %v1877_v41 }
0x1135   :  { %v1866_v55 = vpop.xlane.xlu0 %1865 }
0x1136   :  { %v1870_v56 = vmul.f32 0.03125, %v1866_v55 }
0x1137   :  { %v1869_v57 = vpop.xlane.xlu1 %1868 }
0x1138   :  { %v1884_v59 = vmul.f32 %v1870_v56, %v1870_v56  ;;  %v1871_v60 = vmul.f32 0.03125, %v1869_v57  ;;  %v1882_v7 = vsub.f32 %v3312_v13, %v1870_v56 }
0x1139   :  { %v1876_v58 = vpop.xlane.xlu0 %1875 }
0x113a   :  { %v1880_v61 = vmul.f32 0.03125, %v1876_v58  ;;  %v1885_v0 = vmul.f32 %v1871_v60, %v1871_v60  ;;  %v1883_v12 = vsub.f32 %v3315_v48, %v1871_v60 }
0x113c   :  { %v1886_v62 = vsub.f32 %v1880_v61, %v1884_v59 }
0x113d   :  { %v1879_v63 = vpop.xlane.xlu0 %1878 }
0x113e   :  { %v1888_v1 = vadd.f32 1e-05, %v1886_v62  ;;  %v1881_v2 = vmul.f32 0.03125, %v1879_v63 }
0x1140   :  { %2704 = vrsqrt.f32 %v1888_v1  ;;  %v1887_v3 = vsub.f32 %v1881_v2, %v1885_v0 }
0x1142   :  { %v1889_v6 = vadd.f32 1e-05, %v1887_v3 }
0x1144   :  { %2706 = vrsqrt.f32 %v1889_v6 }
0x114a   :  { %v2705_v8 = vpop.eup %2704 }
0x114b   :  { %v1892_v10 = vmul.f32 %v2705_v8, %v1882_v7 }
0x114d   :  { %v1900_v16 = vmul.f32 %v2190_v11, %v1892_v10 }
0x114e   :  { %v2707_v14 = vpop.eup %2706 }
0x114f   :  { %v1893_v15 = vmul.f32 %v2707_v14, %v1883_v12  ;;  %v1908_v20 = vadd.f32 %v2191_v17, %v1900_v16 }
0x1151   :  { %v1901_v19 = vmul.f32 %v2190_v11, %v1893_v15 }
0x1153   :  { %v1909_v22 = vadd.f32 %v2191_v17, %v1901_v19 }
0x1155   :  { %v1910_v4 = vpack.c.bf16 %v1909_v22, %v1908_v20 }
0x1157   :  { %2458 = vmatmul.mubr.msk.bf16.vlgmr.msra.gmra.mrb[56].mxu1 %vm174_vm1, %v1910_v4 }
0x122a   :  { %v1973_v32 = vpop.f32.mrb[56].mxu1 }
0x122b   :  { %v1974_v34 = vadd.f32 %v2197_v24, %v1973_v32  ;;  %v2459_v18 = vpop.f32.mrb[57].mxu1 }
0x122c   :  { %v1976_v35 = vpop.f32.mrb[58].mxu1 }
0x122d   :  { %v2201_v37 = vmul.f32 -1.702, %v1974_v34  ;;  %v1977_v39 = vadd.f32 %v2197_v24, %v1976_v35  ;;  %v2460_v40 = vpop.f32.mrb[59].mxu1 }
0x122f   :  { %v1984_v42 = vmul.f32 1.442695, %v2201_v37  ;;  %v2202_v43 = vmul.f32 -1.702, %v1977_v39 }
0x1231   :  { %2708 = vpow2.f32 %v1984_v42  ;;  %v1986_v23 = vmul.f32 1.442695, %v2202_v43 }
0x1233   :  { %2710 = vpow2.f32 %v1986_v23 }
0x123b   :  { %v2709_v44 = vpop.eup %2708 }
0x123c   :  { %v1988_v33 = vadd.f32 1.0, %v2709_v44 }
0x123d   :  { %v2711_v36 = vpop.eup %2710 }
0x123e   :  { %2712 = vrcp.f32 %v1988_v33  ;;  %v1989_v45 = vadd.f32 1.0, %v2711_v36 }
0x1240   :  { %2714 = vrcp.f32 %v1989_v45 }
0x1248   :  { %v2713_v27 = vpop.eup %2712 }
0x1249   :  { %v1994_v46 = vmul.f32 %v2713_v27, %v1974_v34 }
0x124a   :  { %v2715_v30 = vpop.eup %2714 }
0x124b   :  { %v1995_v47 = vmul.f32 %v2715_v30, %v1977_v39 }
0x124d   :  { %v1996_v49 = vpack.c.bf16 %v1995_v47, %v1994_v46 }
0x124f   :  { %2478 = vmatmul.mubr.bf16.vlgmr.msra.gmra.mrb[36].mxu0 %v1996_v49 }
0x1322   :  { %v2104_v51 = vpop.f32.mrb[36].mxu0 }
0x1323   :  { %v2105_v38 = vadd.f32 %v2220_v50, %v2104_v51  ;;  %v2479_v52 = vpop.f32.mrb[37].mxu0 }
0x1324   :  { %v2107_v41 = vpop.f32.mrb[38].mxu0 }
0x1325   :  { %v2111_v53 = vadd.f32 %v2105_v38, %v3312_v13  ;;  %v2108_v54 = vadd.f32 %v2220_v50, %v2107_v41  ;;  %v2480_v55 = vpop.f32.mrb[39].mxu0 }
0x1327   :  { %2113 = vst.msk [vmem:[%s3408_s18] sm:$0xff] %vm174_vm1, %v2111_v53  ;;  %v2112_v56 = vadd.f32 %v2108_v54, %v3315_v48 }
0x1329   :  { %2114 = vst.msk [vmem:[%s3408_s18 + $0x8] sm:$0xff] %vm174_vm1, %v2112_v56 }

</bundles_post_ra>
